<compile_context>
chip_gen: v7x
topology: tpu7x:2x2x1
jax: 0.10.0
libtpu: 0.0.40
codegen_flags: <defaults>
</compile_context>

<pallas_src>
import functools

import jax
import jax.numpy as jnp
from jax import lax
from jax.experimental import pallas as pl
from jax.experimental.pallas import tpu as pltpu


def _critic_kernel(xt_ref, w1_ref, b1_ref, w2_ref, b2_ref, w3_ref, o_ref):
    xt = xt_ref[...]                                          # (state_dim, block_b) bf16
    # Layer 1: (hidden, state_dim) @ (state_dim, block_b) -> (hidden, block_b), f32 accum.
    h1 = jnp.dot(w1_ref[...], xt, preferred_element_type=jnp.float32) + b1_ref[...]
    h1 = jnp.maximum(h1, 0.0).astype(jnp.bfloat16)
    # Layer 2: (hidden, hidden) @ (hidden, block_b) -> (hidden, block_b).
    h2 = jnp.dot(w2_ref[...], h1, preferred_element_type=jnp.float32) + b2_ref[...]
    h2 = jnp.maximum(h2, 0.0).astype(jnp.bfloat16)
    # Layer 3: (1, hidden) @ (hidden, block_b) -> (1, block_b), lane-dense.
    out = jnp.dot(w3_ref[...], h2, preferred_element_type=jnp.float32)
    o_ref[...] = out.astype(o_ref.dtype)


def _round_up(x, m):
    return ((x + m - 1) // m) * m


def _choose_block_b(B, state_dim, hidden_dim, block_b):
    """Pick a lane-aligned batch tile from the true per-step VMEM footprint."""
    block_b = max(128, _round_up(min(block_b, max(B, 1)), 128))
    # >= 2 grid steps whenever possible so v7x's 2 TensorCores both get work
    # (harmless on single-TC v5e/v6e).
    if B > 128:
        block_b = min(block_b, _round_up(-(-B // 2), 128))

    def footprint(bb):
        temps = bb * hidden_dim * (4 + 2) * 2          # h1_t/h2_t f32 + bf16 casts
        xt = 2 * max(state_dim, 8) * bb * 2            # double-buffered bf16 input
        out = 2 * 8 * bb * 4                           # double-buffered f32 output (8-sublane pad)
        w = 2 * (hidden_dim * state_dim + hidden_dim * hidden_dim + hidden_dim) * 2
        b = 2 * 2 * hidden_dim * 4
        return temps + xt + out + w + b

    budget = 10 * 1024 * 1024                          # fits v5e's 16 MiB default scoped VMEM
    while block_b > 128 and footprint(block_b) > budget:
        block_b -= 128
    return block_b


@functools.partial(jax.jit, static_argnames=("block_b",))
def critic_forward(x, w1, b1, w2, b2, w3, b3, *, block_b=2048):
    """x: (B, state_dim) f32.  Weights in PyTorch nn.Linear layout [out, in]."""
    B, state_dim = x.shape
    hidden_dim = w1.shape[0]

    block_b = _choose_block_b(B, state_dim, hidden_dim, block_b)
    grid = (pl.cdiv(B, block_b),)

    # One-time XLA-side preprocessing: transpose only the small input and cast
    # MXU operands to bf16 (f32 accumulation happens in-kernel).
    x_t = x.T.astype(jnp.bfloat16)                     # (state_dim, B)
    w1_bf = w1.astype(jnp.bfloat16)                    # (hidden, state_dim)
    w2_bf = w2.astype(jnp.bfloat16)                    # (hidden, hidden)
    w3_bf = w3.reshape(1, hidden_dim).astype(jnp.bfloat16)
    b1_col = b1.reshape(hidden_dim, 1).astype(jnp.float32)
    b2_col = b2.reshape(hidden_dim, 1).astype(jnp.float32)

    in_specs = [
        pl.BlockSpec((state_dim, block_b), lambda i: (0, i)),       # x_t tile
        pl.BlockSpec((hidden_dim, state_dim), lambda i: (0, 0)),    # W1 (resident)
        pl.BlockSpec((hidden_dim, 1), lambda i: (0, 0)),            # b1 column
        pl.BlockSpec((hidden_dim, hidden_dim), lambda i: (0, 0)),   # W2 (resident)
        pl.BlockSpec((hidden_dim, 1), lambda i: (0, 0)),            # b2 column
        pl.BlockSpec((1, hidden_dim), lambda i: (0, 0)),            # w3 row
    ]
    out_spec = pl.BlockSpec((1, block_b), lambda i: (0, i))         # lane-dense output

    cost = pl.CostEstimate(
        flops=2 * B * (state_dim * hidden_dim + hidden_dim * hidden_dim + hidden_dim),
        transcendentals=0,
        bytes_accessed=(B * state_dim * 2 + B * 4
                        + (hidden_dim * state_dim + hidden_dim * hidden_dim
                           + hidden_dim) * 2
                        + 2 * hidden_dim * 4),
    )

    out_row = pl.pallas_call(
        _critic_kernel,
        out_shape=jax.ShapeDtypeStruct((1, B), jnp.float32),
        grid_spec=pltpu.PrefetchScalarGridSpec(
            num_scalar_prefetch=0,
            grid=grid,
            in_specs=in_specs,
            out_specs=out_spec,
        ),
        compiler_params=pltpu.CompilerParams(
            dimension_semantics=("parallel",),
            vmem_limit_bytes=32 * 1024 * 1024,
        ),
        cost_estimate=cost,
    )(x_t, w1_bf, b1_col, w2_bf, b2_col, w3_bf)

    # (1, B) -> (B, 1) is a free reshape (same linear order); fold in scalar b3.
    return out_row.reshape(B, 1) + b3


def init_critic_params(key, state_dim, hidden_dim):
    """PyTorch-style init: W [out, in] ~ U(-1/sqrt(fan_in), 1/sqrt(fan_in)), b [out]."""
    ks = jax.random.split(key, 6)

    def linear_init(kw, kb, fan_in, fan_out):
        bound = 1.0 / (fan_in ** 0.5)
        w = jax.random.uniform(kw, (fan_out, fan_in), jnp.float32, -bound, bound)
        b = jax.random.uniform(kb, (fan_out,), jnp.float32, -bound, bound)
        return w, b

    w1, b1 = linear_init(ks[0], ks[1], state_dim, hidden_dim)
    w2, b2 = linear_init(ks[2], ks[3], hidden_dim, hidden_dim)
    w3, b3 = linear_init(ks[4], ks[5], hidden_dim, 1)
    return w1, b1, w2, b2, w3, b3


def critic_reference(x, w1, b1, w2, b2, w3, b3, *, compute_dtype=jnp.float32,
                     precision=None):
    """Plain-JAX reference in PyTorch semantics: relu(x@W1.T+b1) ... @W3.T + b3."""
    cd = compute_dtype
    h1 = jnp.dot(x.astype(cd), w1.astype(cd).T,
                 preferred_element_type=jnp.float32, precision=precision) + b1
    h1 = jnp.maximum(h1, 0.0)
    h2 = jnp.dot(h1.astype(cd), w2.astype(cd).T,
                 preferred_element_type=jnp.float32, precision=precision) + b2
    h2 = jnp.maximum(h2, 0.0)
    return jnp.dot(h2.astype(cd), w3.astype(cd).T,
                   preferred_element_type=jnp.float32, precision=precision) + b3


if __name__ == "__main__":
    key = jax.random.PRNGKey(0)
    k_x, k_p = jax.random.split(key)

    batch = 384          # -> block_b=256, 2 grid steps, second tile partial
    state_dim = 16
    hidden_dim = 256     # PyTorch module default

    x = jax.random.normal(k_x, (batch, state_dim), jnp.float32)
    params = init_critic_params(k_p, state_dim, hidden_dim)

    out = critic_forward(x, *params)
    out = jax.block_until_ready(out)
    assert out.shape == (batch, 1)

    # Tight check against a reference with matching numerics (bf16 operands,
    # f32 accumulation), loose sanity check against the full-f32 reference.
    ref_bf16 = critic_reference(x, *params, compute_dtype=jnp.bfloat16)
    ref_f32 = critic_reference(x, *params, compute_dtype=jnp.float32,
                               precision=lax.Precision.HIGHEST)
    assert jnp.allclose(out, ref_bf16, atol=1e-3, rtol=1e-3), "mismatch vs bf16-matched reference"
    assert jnp.allclose(out, ref_f32, atol=5e-2, rtol=5e-2), "mismatch vs f32 reference"

    print("KERNEL_OK")
</pallas_src>

<mosaic_0001>
module attributes {stable_mosaic.version = 11 : i64} {
  func.func @_critic_kernel(%arg0: i32, %arg1: memref<16x256xbf16, #tpu.memory_space<vmem>>, %arg2: memref<256x16xbf16, #tpu.memory_space<vmem>>, %arg3: memref<256x1xf32, #tpu.memory_space<vmem>>, %arg4: memref<256x256xbf16, #tpu.memory_space<vmem>>, %arg5: memref<256x1xf32, #tpu.memory_space<vmem>>, %arg6: memref<1x256xbf16, #tpu.memory_space<vmem>>, %arg7: memref<1x256xf32, #tpu.memory_space<vmem>>) attributes {dimension_semantics = [#tpu.dimension_semantics<parallel>], iteration_bounds = array<i64: 2>, scalar_prefetch = 0 : i64, scratch_operands = 0 : i64, tpu.core_type = #tpu.core_type<tc>, window_params = [{transform_indices = @transform_0, window_bounds = array<i64: 16, 256>}, {pipeline_mode = #tpu.pipeline_mode<synchronous>, transform_indices = @transform_1, window_bounds = array<i64: 256, 16>}, {pipeline_mode = #tpu.pipeline_mode<synchronous>, transform_indices = @transform_2, window_bounds = array<i64: 256, 1>}, {pipeline_mode = #tpu.pipeline_mode<synchronous>, transform_indices = @transform_3, window_bounds = array<i64: 256, 256>}, {pipeline_mode = #tpu.pipeline_mode<synchronous>, transform_indices = @transform_4, window_bounds = array<i64: 256, 1>}, {pipeline_mode = #tpu.pipeline_mode<synchronous>, transform_indices = @transform_5, window_bounds = array<i64: 1, 256>}, {transform_indices = @transform_6, window_bounds = array<i64: 1, 256>}]} {
    %c0 = arith.constant 0 : index
    %c0_0 = arith.constant 0 : index
    %0 = vector.load %arg1[%c0, %c0_0] : memref<16x256xbf16, #tpu.memory_space<vmem>>, vector<16x256xbf16>
    %c0_1 = arith.constant 0 : index
    %c0_2 = arith.constant 0 : index
    %1 = vector.load %arg2[%c0_1, %c0_2] : memref<256x16xbf16, #tpu.memory_space<vmem>>, vector<256x16xbf16>
    %cst = arith.constant dense<0.000000e+00> : vector<256x256xf32>
    %2 = tpu.matmul %1, %0, %cst {dimension_numbers = #tpu.dot_dimension_numbers<[1], [0], [0], [1], [0, 0, 1, 1], [], []>} : vector<256x16xbf16>, vector<16x256xbf16>, vector<256x256xf32> -> vector<256x256xf32>
    %c0_3 = arith.constant 0 : index
    %c0_4 = arith.constant 0 : index
    %3 = vector.load %arg3[%c0_3, %c0_4] : memref<256x1xf32, #tpu.memory_space<vmem>>, vector<256x1xf32>
    %4 = vector.broadcast %3 : vector<256x1xf32> to vector<256x256xf32>
    %5 = arith.addf %2, %4 : vector<256x256xf32>
    %cst_5 = arith.constant 0.000000e+00 : f32
    %6 = vector.broadcast %cst_5 : f32 to vector<256x256xf32>
    %7 = arith.maximumf %5, %6 : vector<256x256xf32>
    %8 = arith.truncf %7 : vector<256x256xf32> to vector<256x256xbf16>
    %c0_6 = arith.constant 0 : index
    %c0_7 = arith.constant 0 : index
    %9 = vector.load %arg4[%c0_6, %c0_7] : memref<256x256xbf16, #tpu.memory_space<vmem>>, vector<256x256xbf16>
    %cst_8 = arith.constant dense<0.000000e+00> : vector<256x256xf32>
    %10 = tpu.matmul %9, %8, %cst_8 {dimension_numbers = #tpu.dot_dimension_numbers<[1], [0], [0], [1], [0, 0, 1, 1], [], []>} : vector<256x256xbf16>, vector<256x256xbf16>, vector<256x256xf32> -> vector<256x256xf32>
    %c0_9 = arith.constant 0 : index
    %c0_10 = arith.constant 0 : index
    %11 = vector.load %arg5[%c0_9, %c0_10] : memref<256x1xf32, #tpu.memory_space<vmem>>, vector<256x1xf32>
    %12 = vector.broadcast %11 : vector<256x1xf32> to vector<256x256xf32>
    %13 = arith.addf %10, %12 : vector<256x256xf32>
    %cst_11 = arith.constant 0.000000e+00 : f32
    %14 = vector.broadcast %cst_11 : f32 to vector<256x256xf32>
    %15 = arith.maximumf %13, %14 : vector<256x256xf32>
    %16 = arith.truncf %15 : vector<256x256xf32> to vector<256x256xbf16>
    %c0_12 = arith.constant 0 : index
    %c0_13 = arith.constant 0 : index
    %17 = vector.load %arg6[%c0_12, %c0_13] : memref<1x256xbf16, #tpu.memory_space<vmem>>, vector<1x256xbf16>
    %cst_14 = arith.constant dense<0.000000e+00> : vector<1x256xf32>
    %18 = tpu.matmul %17, %16, %cst_14 {dimension_numbers = #tpu.dot_dimension_numbers<[1], [0], [0], [1], [0, 0, 1, 1], [], []>} : vector<1x256xbf16>, vector<256x256xbf16>, vector<1x256xf32> -> vector<1x256xf32>
    %c0_15 = arith.constant 0 : index
    %c0_16 = arith.constant 0 : index
    %19 = vector.load %arg7[%c0_15, %c0_16] : memref<1x256xf32, #tpu.memory_space<vmem>>, vector<1x256xf32>
    tpu.vector_store %arg7[%c0_15, %c0_16], %18 {strides = array<i32>} : memref<1x256xf32, #tpu.memory_space<vmem>>, vector<1x256xf32>,
    return
  }
  func.func @transform_0(%arg0: i32) -> (i32, i32) {
    %c0_i32 = arith.constant 0 : i32
    %c0_i32_0 = arith.constant 0 : i32
    return %c0_i32, %arg0 : i32, i32
  }
  func.func @transform_1(%arg0: i32) -> (i32, i32) {
    %c0_i32 = arith.constant 0 : i32
    %c0_i32_0 = arith.constant 0 : i32
    %c0_i32_1 = arith.constant 0 : i32
    return %c0_i32, %c0_i32_0 : i32, i32
  }
  func.func @transform_2(%arg0: i32) -> (i32, i32) {
    %c0_i32 = arith.constant 0 : i32
    %c0_i32_0 = arith.constant 0 : i32
    %c0_i32_1 = arith.constant 0 : i32
    return %c0_i32, %c0_i32_0 : i32, i32
  }
  func.func @transform_3(%arg0: i32) -> (i32, i32) {
    %c0_i32 = arith.constant 0 : i32
    %c0_i32_0 = arith.constant 0 : i32
    %c0_i32_1 = arith.constant 0 : i32
    return %c0_i32, %c0_i32_0 : i32, i32
  }
  func.func @transform_4(%arg0: i32) -> (i32, i32) {
    %c0_i32 = arith.constant 0 : i32
    %c0_i32_0 = arith.constant 0 : i32
    %c0_i32_1 = arith.constant 0 : i32
    return %c0_i32, %c0_i32_0 : i32, i32
  }
  func.func @transform_5(%arg0: i32) -> (i32, i32) {
    %c0_i32 = arith.constant 0 : i32
    %c0_i32_0 = arith.constant 0 : i32
    %c0_i32_1 = arith.constant 0 : i32
    return %c0_i32, %c0_i32_0 : i32, i32
  }
  func.func @transform_6(%arg0: i32) -> (i32, i32) {
    %c0_i32 = arith.constant 0 : i32
    %c0_i32_0 = arith.constant 0 : i32
    return %c0_i32, %arg0 : i32, i32
  }
}

</mosaic_0001>

<bundles_post_ra>
// kernel: critic_forward.1
= control target key start
LH: loop header
LB: loop body
LE: loop exit
PB: predicated region body
PF: predicated region fallthrough
CT: control target
= control target key end

     0   :  { %s4683_s0 = inlined_call_operand.vmem [shape: bf16[16,384], index: 0, kind: input, shape index: {}]   ;;  %s4684_s1 = inlined_call_operand.vmem [shape: bf16[256,16], index: 1, kind: input, shape index: {}]   ;;  %s4685_s2 = inlined_call_operand.vmem [shape: f32[256,1], index: 2, kind: input, shape index: {}]   ;;  %s4686_s3 = inlined_call_operand.vmem [shape: bf16[256,256], index: 3, kind: input, shape index: {}]   ;;  %s4687_s4 = inlined_call_operand.vmem [shape: f32[256,1], index: 4, kind: input, shape index: {}]   ;;  %s4688_s5 = inlined_call_operand.vmem [shape: bf16[1,256], index: 5, kind: input, shape index: {}]   ;;  %s4689_s6 = inlined_call_operand.vmem [shape: f32[1,384], index: 6, kind: output, shape index: {}]  }
   0x1   :  { %4691 = sst [smem:[#allocation4_spill]] %s4683_s0 }
   0x2   :  { %s3538_s21 = smov 0   ;;  %s3540_s22 = smov 0  }
   0x3   :  { %s3542_s23 = smov 0  }
   0x4 LB: > { %s4690_s24 = sadd.s32 4294967295, %s3367_s23   ;;  %s3555_s25 = sadd.s32 1, %s3367_s23   ;;  %s3367_s23 = sphi %s3542_s23, %s4717_s23   ;;  %s3363_s22 = sphi %s3540_s22, %s4716_s22   ;;  %s3359_s21 = sphi %s3538_s21, %s4715_s21  }
   0x5   : > { %s20_s26 = ssub.s32 %s3367_s23, %s3555_s25  ;;  %s23_s27 = sadd.s32 1, %s3363_s22 }
   0x6   : > { %p21_p0 = scmp.eq.s32.totalorder %s20_s26, 0  ;;  %p30_p1 = scmp.ne.s32.totalorder %s3363_s22, %s3359_s21 }
   0x7   : > { %p31_p2 = scmp.eq.s32.totalorder %s3367_s23, 0  ;;  %p165_p3 = scmp.eq.s32.totalorder %s4690_s24, 1 }
   0x8   : > { %s3566_s28 = scalar_select %p21_p0, %s3363_s22, %s23_s27  }
   0x9   : > { %p32_p4 = por %p31_p2, %p30_p1  ;;  %p3568_p5 = por %p165_p3, %p30_p1 }
   0xa   : > { %p2728_p6 = scmp.ge.s32.totalorder %s3367_s23, 2 }
   0xc   : > { %202 = sbr.rel (%p2728_p6) target bundleno = 161 (0xa1), region = 36 }
  0x13   : > { %205 = sbr.rel (!%p32_p4) target bundleno = 161 (0xa1), region = 40  ;;  %s207_s30 = sand.u32 (%p32_p4), 1, %s3363_s22  }
  0x14   : > { %s2730_s7 = sshll.u32 (%p32_p4), %s3367_s23, 1  ;;  %s2729_s8 = sshll.u32 (%p32_p4), %s207_s30, 4 }
  0x15   : > { %s211_s9 = ssub.s32 (%p32_p4), 3, %s2730_s7  ;;  %s2853_s10 = sshll.u32 (%p32_p4), %s3367_s23, 3 }
  0x16   : > { %p212_p7 = scmp.lt.s32.totalorder (%p32_p4), %s211_s9, 2  ;;  %s4693_s0 = sld [smem:[#allocation4_spill]] (%p32_p4) }
  0x17   : > { %s3583_s16 = scalar_lea.vmem (%p32_p4), [#allocation2], %s2729_s8  }
  0x1a   : > { %s4719_s9 = smov (!%p212_p7, %s211_s9), 2 }
  0x1b   : > { %s2731_s14 = sshll.u32 %s4719_s9, 7  ;;  %s3581_s15 = sshll.u32 %s4719_s9, 2 }
  0x1c   : > { %s3579_s13 = scalar_lea.vmem %s4693_s0, %s2853_s10   ;;  %p2735_p8 = scmp.eq.s32.totalorder %s2731_s14, 0 }
  0x1d   : > { %p222_p9 = scmp.lt.u32.totalorder (!%p2735_p8), %s3581_s15, 8 }
  0x1e   : > { %221 = sbr.rel (%p2735_p8) target bundleno = 161 (0xa1), region = 44 }
  0x25   : > { %225 = sbr.rel (%p222_p9) target bundleno = 152 (0x98), region = 48  ;;  %s3587_s17 = sand.u32 (!%p222_p9), 7, %s3581_s15  }
  0x26   : > { %p243_p10 = scmp.eq.s32.totalorder (!%p222_p9), %s3587_s17, 0  ;;  %p2736_p11 = scmp.ne.s32.totalorder (!%p222_p9), %s3587_s17, 0 }
  0x2c   : > { %246 = sbr.rel (%p2736_p11) target bundleno = 96 (0x60), region = 63  ;;  %s247_s18 = sshrl.u32 (!%p2736_p11), %s3581_s15, 3 }
  0x2d   : > { %s3594_s19 = sshrl.u32 (!%p2736_p11), %s247_s18, 5 }
  0x2e   : > { %p2737_p12 = scmp.le.s32.totalorder (!%p2736_p11), %s3594_s19, 0 }
  0x33   : > { %2598 = sbr.rel (%p2737_p12) target bundleno = 76 (0x4c), region = 241  ;;  %s4694_s20 = smov (!%p2737_p12), %s3583_s16 }
  0x34   : > { %s4695_s26 = smov (!%p2737_p12), %s3579_s13  ;;  %s3603_s27 = smov (!%p2737_p12), 0  }
  0x35   : > { %s3605_s30 = smov (!%p2737_p12), 0  }
  0x3a LB: >> { %v260_v0 = vld [vmem:[%s3375_s26] sm:$0xff]  ;;  %v324_v1 = vld [vmem:[%s3375_s26 + $0xc] sm:$0xff]  ;;  %v326_v2 = vld [vmem:[%s3375_s26 + $0x14] sm:$0xff]  ;;  %s388_s7 = sadd.s32 1, %s3379_s27  ;;  %s254_s30 = sadd.s32 1, %s3383_s30   ;;  %s3383_s30 = sphi %s3605_s30, %s254_s30   ;;  %s3379_s27 = sphi %s3603_s27, %s4698_s27   ;;  %s3375_s26 = sphi %s4695_s26, %s4697_s26   ;;  %s3371_s20 = sphi %s4694_s20, %s4696_s20  }
  0x3b   : >> { %261 = vst [vmem:[%s3371_s20] sm:$0xff] %v260_v0  ;;  %325 = vst [vmem:[%s3371_s20 + $0x8] sm:$0xff] %v324_v1  ;;  %v328_v3 = vld [vmem:[%s3375_s26 + $0x1c] sm:$0xff]  ;;  %v330_v4 = vld [vmem:[%s3375_s26 + $0x24] sm:$0xff]  ;;  %p389_p13 = scmp.ge.s32.totalorder %s388_s7, %s3594_s19  ;;  %p253_p0 = scmp.ge.s32.totalorder %s254_s30, %s3594_s19 }
  0x3c   : >> { %327 = vst [vmem:[%s3371_s20 + $0x10] sm:$0xff] %v326_v2  ;;  %v332_v5 = vld [vmem:[%s3375_s26 + $0x2c] sm:$0xff]  ;;  %329 = vst [vmem:[%s3371_s20 + $0x18] sm:$0xff] %v328_v3  ;;  %v334_v6 = vld [vmem:[%s3375_s26 + $0x34] sm:$0xff] }
  0x3d   : >> { %331 = vst [vmem:[%s3371_s20 + $0x20] sm:$0xff] %v330_v4  ;;  %333 = vst [vmem:[%s3371_s20 + $0x28] sm:$0xff] %v332_v5  ;;  %v336_v7 = vld [vmem:[%s3375_s26 + $0x3c] sm:$0xff]  ;;  %v338_v8 = vld [vmem:[%s3375_s26 + $0x44] sm:$0xff]  ;;  %s4721_s7 = smov (%p389_p13, %s388_s7), 0 }
  0x3e   : >> { %335 = vst [vmem:[%s3371_s20 + $0x30] sm:$0xff] %v334_v6  ;;  %337 = vst [vmem:[%s3371_s20 + $0x38] sm:$0xff] %v336_v7  ;;  %v340_v9 = vld [vmem:[%s3375_s26 + $0x4c] sm:$0xff]  ;;  %v342_v10 = vld [vmem:[%s3375_s26 + $0x54] sm:$0xff]  ;;  %s2738_s8 = sshll.u32 %s4721_s7, 8  ;;  %s4698_s27 = smov %s4721_s7 }
  0x3f   : >> { %339 = vst [vmem:[%s3371_s20 + $0x40] sm:$0xff] %v338_v8  ;;  %v344_v11 = vld [vmem:[%s3375_s26 + $0x5c] sm:$0xff]  ;;  %341 = vst [vmem:[%s3371_s20 + $0x48] sm:$0xff] %v340_v9  ;;  %v346_v12 = vld [vmem:[%s3375_s26 + $0x64] sm:$0xff]  ;;  %s393_s9 = scalar_lea.vmem %s3579_s13, %s2738_s8   ;;  %s394_s10 = scalar_lea.vmem %s3583_s16, %s2738_s8 [#allocation2]  }
  0x40   : >> { %343 = vst [vmem:[%s3371_s20 + $0x50] sm:$0xff] %v342_v10  ;;  %345 = vst [vmem:[%s3371_s20 + $0x58] sm:$0xff] %v344_v11  ;;  %v348_v13 = vld [vmem:[%s3375_s26 + $0x6c] sm:$0xff]  ;;  %v350_v14 = vld [vmem:[%s3375_s26 + $0x74] sm:$0xff] }
  0x41   : >> { %347 = vst [vmem:[%s3371_s20 + $0x60] sm:$0xff] %v346_v12  ;;  %349 = vst [vmem:[%s3371_s20 + $0x68] sm:$0xff] %v348_v13  ;;  %v352_v15 = vld [vmem:[%s3375_s26 + $0x7c] sm:$0xff]  ;;  %v354_v16 = vld [vmem:[%s3375_s26 + $0x84] sm:$0xff] }
  0x42   : >> { %351 = vst [vmem:[%s3371_s20 + $0x70] sm:$0xff] %v350_v14  ;;  %v356_v17 = vld [vmem:[%s3375_s26 + $0x8c] sm:$0xff]  ;;  %353 = vst [vmem:[%s3371_s20 + $0x78] sm:$0xff] %v352_v15  ;;  %v358_v18 = vld [vmem:[%s3375_s26 + $0x94] sm:$0xff] }
  0x43   : >> { %355 = vst [vmem:[%s3371_s20 + $0x80] sm:$0xff] %v354_v16  ;;  %357 = vst [vmem:[%s3371_s20 + $0x88] sm:$0xff] %v356_v17  ;;  %v360_v19 = vld [vmem:[%s3375_s26 + $0x9c] sm:$0xff]  ;;  %v362_v20 = vld [vmem:[%s3375_s26 + $0xa4] sm:$0xff] }
  0x44   : >> { %359 = vst [vmem:[%s3371_s20 + $0x90] sm:$0xff] %v358_v18  ;;  %361 = vst [vmem:[%s3371_s20 + $0x98] sm:$0xff] %v360_v19  ;;  %v364_v21 = vld [vmem:[%s3375_s26 + $0xac] sm:$0xff]  ;;  %v366_v22 = vld [vmem:[%s3375_s26 + $0xb4] sm:$0xff] }
  0x45   : >> { %363 = vst [vmem:[%s3371_s20 + $0xa0] sm:$0xff] %v362_v20  ;;  %v368_v23 = vld [vmem:[%s3375_s26 + $0xbc] sm:$0xff]  ;;  %365 = vst [vmem:[%s3371_s20 + $0xa8] sm:$0xff] %v364_v21  ;;  %v370_v24 = vld [vmem:[%s3375_s26 + $0xc4] sm:$0xff]  ;;  %256 = sbr.rel (!%p253_p0) target bundleno = 58 (0x3a), region = 247 }
  0x46   : >> { %367 = vst [vmem:[%s3371_s20 + $0xb0] sm:$0xff] %v366_v22  ;;  %369 = vst [vmem:[%s3371_s20 + $0xb8] sm:$0xff] %v368_v23  ;;  %v372_v25 = vld [vmem:[%s3375_s26 + $0xcc] sm:$0xff]  ;;  %v374_v26 = vld [vmem:[%s3375_s26 + $0xd4] sm:$0xff] }
  0x47   : >> { %371 = vst [vmem:[%s3371_s20 + $0xc0] sm:$0xff] %v370_v24  ;;  %373 = vst [vmem:[%s3371_s20 + $0xc8] sm:$0xff] %v372_v25  ;;  %v376_v27 = vld [vmem:[%s3375_s26 + $0xdc] sm:$0xff]  ;;  %v378_v28 = vld [vmem:[%s3375_s26 + $0xe4] sm:$0xff] }
  0x48   : >> { %375 = vst [vmem:[%s3371_s20 + $0xd0] sm:$0xff] %v374_v26  ;;  %v380_v29 = vld [vmem:[%s3375_s26 + $0xec] sm:$0xff]  ;;  %377 = vst [vmem:[%s3371_s20 + $0xd8] sm:$0xff] %v376_v27  ;;  %v382_v30 = vld [vmem:[%s3375_s26 + $0xf4] sm:$0xff] }
  0x49   : >> { %379 = vst [vmem:[%s3371_s20 + $0xe0] sm:$0xff] %v378_v28  ;;  %381 = vst [vmem:[%s3371_s20 + $0xe8] sm:$0xff] %v380_v29  ;;  %v384_v31 = vld [vmem:[%s3375_s26 + $0xfc] sm:$0xff]  ;;  %v386_v32 = vld [vmem:[%s3375_s26 + $0x104] sm:$0xff]  ;;  %s4697_s26 = smov %s393_s9 }
  0x4a   : >> { %383 = vst [vmem:[%s3371_s20 + $0xf0] sm:$0xff] %v382_v30  ;;  %385 = vst [vmem:[%s3371_s20 + $0xf8] sm:$0xff] %v384_v31 }
  0x4b   : >> { %387 = vst [vmem:[%s3371_s20 + $0x100] sm:$0xff] %v386_v32  ;;  %s4696_s20 = smov %s394_s10 }
  0x4c PF: > { %s3705_s11 = sand.u32 31, %s247_s18   ;;  %s2854_s12 = sshll.u32 %s3594_s19, 12 }
  0x4d   : > { %s399_s14 = sshra.s32 %s2854_s12, 4  ;;  %p2743_p1 = scmp.le.s32.totalorder %s3705_s11, 0 }
  0x4e   : > { %s3709_s8 = scalar_lea.vmem %s3579_s13, %s399_s14   ;;  %s403_s10 = scalar_lea.vmem %s3583_s16, %s399_s14 [#allocation2]  }
  0x4f   : > { %2612 = sbr.rel (%p2743_p1) target bundleno = 96 (0x60), region = 252  ;;  %s3385_s7 = smov (!%p2743_p1), %s403_s10  }
  0x50   : > { %s3389_s30 = smov (!%p2743_p1), %s3709_s8   ;;  %s3393_s9 = smov (!%p2743_p1), 0  }
  0x51   : > { %s3397_s20 = smov (!%p2743_p1), 0  }
  0x56 LB: >> { %v415_v33 = vld [vmem:[%s3391_s30] sm:$0xff]  ;;  %v417_v34 = vld [vmem:[%s3391_s30 + $0xc] sm:$0xff]  ;;  %s419_s18 = sadd.s32 1, %s3395_s9  ;;  %s409_s20 = sadd.s32 1, %s3399_s20   ;;  %s3399_s20 = sphi %s3397_s20, %s409_s20   ;;  %s3395_s9 = sphi %s3393_s9, %s3394_s9   ;;  %s3391_s30 = sphi %s3389_s30, %s424_s30   ;;  %s3387_s7 = sphi %s3385_s7, %s425_s7  }
  0x57   : >> { %416 = vst [vmem:[%s3387_s7] sm:$0xff] %v415_v33  ;;  %418 = vst [vmem:[%s3387_s7 + $0x8] sm:$0xff] %v417_v34  ;;  %p420_p2 = scmp.ge.s32.totalorder %s419_s18, %s3705_s11  ;;  %p408_p3 = scmp.ge.s32.totalorder %s409_s20, %s3705_s11 }
  0x59   : >> { %s4723_s18 = smov (%p420_p2, %s419_s18), 0  ;;  %411 = sbr.rel (!%p408_p3) target bundleno = 86 (0x56), region = 258 }
  0x5a   : >> { %s2744_s19 = sshll.u32 %s4723_s18, 3  ;;  %s3394_s9 = smov %s4723_s18  }
  0x5b   : >> { %s424_s30 = scalar_lea.vmem %s3709_s8, %s2744_s19   ;;  %s425_s7 = scalar_lea.vmem %s403_s10, %s2744_s19 [#allocation2]  }
  0x60 PF: > { %428 = sbr.rel (%p243_p10) target bundleno = 152 (0x98), region = 81  ;;  %s430_s26 = ssub.s32 (!%p243_p10), %s3581_s15, %s3587_s17 }
  0x61   : > { %s434_s27 = sshrl.u32 (!%p243_p10), %s3581_s15, 3  ;;  %s3723_s12 = scalar_lea.vmem (!%p243_p10), %s3579_s13, %s430_s26 }
  0x62   : > { %s3726_s14 = scalar_lea.vmem (!%p243_p10), %s3583_s16, %s430_s26 [#allocation2]  ;;  %s3730_s7 = sshrl.u32 (!%p243_p10), %s434_s27, 5 }
  0x63   : > { %p2746_p4 = scmp.le.s32.totalorder (!%p243_p10), %s3730_s7, 0 }
  0x67   : > { %2626 = sbr.rel (%p2746_p4) target bundleno = 128 (0x80), region = 263  ;;  %s4699_s11 = smov (!%p2746_p4), %s3583_s16 }
  0x68   : > { %s4700_s8 = smov (!%p2746_p4), %s3579_s13  ;;  %s3739_s10 = smov (!%p2746_p4), 0  }
  0x69   : > { %s3741_s30 = smov (!%p2746_p4), 0  }
  0x6e LB: >> { %v447_v35 = vld [vmem:[%s3407_s8] sm:$0xff]  ;;  %v511_v36 = vld [vmem:[%s3407_s8 + $0xc] sm:$0xff]  ;;  %v513_v37 = vld [vmem:[%s3407_s8 + $0x14] sm:$0xff]  ;;  %s575_s9 = sadd.s32 1, %s3411_s10  ;;  %s441_s30 = sadd.s32 1, %s3415_s30   ;;  %s3415_s30 = sphi %s3741_s30, %s441_s30   ;;  %s3411_s10 = sphi %s3739_s10, %s4703_s10   ;;  %s3407_s8 = sphi %s4700_s8, %s4702_s8   ;;  %s3403_s11 = sphi %s4699_s11, %s4701_s11  }
  0x6f   : >> { %448 = vst [vmem:[%s3403_s11] sm:$0xff] %v447_v35  ;;  %512 = vst [vmem:[%s3403_s11 + $0x8] sm:$0xff] %v511_v36  ;;  %v515_v38 = vld [vmem:[%s3407_s8 + $0x1c] sm:$0xff]  ;;  %v517_v39 = vld [vmem:[%s3407_s8 + $0x24] sm:$0xff]  ;;  %p576_p6 = scmp.ge.s32.totalorder %s575_s9, %s3730_s7  ;;  %p440_p7 = scmp.ge.s32.totalorder %s441_s30, %s3730_s7 }
  0x70   : >> { %514 = vst [vmem:[%s3403_s11 + $0x10] sm:$0xff] %v513_v37  ;;  %v519_v40 = vld [vmem:[%s3407_s8 + $0x2c] sm:$0xff]  ;;  %516 = vst [vmem:[%s3403_s11 + $0x18] sm:$0xff] %v515_v38  ;;  %v521_v41 = vld [vmem:[%s3407_s8 + $0x34] sm:$0xff] }
  0x71   : >> { %518 = vst [vmem:[%s3403_s11 + $0x20] sm:$0xff] %v517_v39  ;;  %520 = vst [vmem:[%s3403_s11 + $0x28] sm:$0xff] %v519_v40  ;;  %v523_v42 = vld [vmem:[%s3407_s8 + $0x3c] sm:$0xff]  ;;  %v525_v43 = vld [vmem:[%s3407_s8 + $0x44] sm:$0xff]  ;;  %s4725_s9 = smov (%p576_p6, %s575_s9), 0 }
  0x72   : >> { %522 = vst [vmem:[%s3403_s11 + $0x30] sm:$0xff] %v521_v41  ;;  %524 = vst [vmem:[%s3403_s11 + $0x38] sm:$0xff] %v523_v42  ;;  %v527_v44 = vld [vmem:[%s3407_s8 + $0x4c] sm:$0xff]  ;;  %v529_v45 = vld [vmem:[%s3407_s8 + $0x54] sm:$0xff]  ;;  %s2747_s20 = sshll.u32 %s4725_s9, 8  ;;  %s4703_s10 = smov %s4725_s9 }
  0x73   : >> { %526 = vst [vmem:[%s3403_s11 + $0x40] sm:$0xff] %v525_v43  ;;  %v531_v46 = vld [vmem:[%s3407_s8 + $0x5c] sm:$0xff]  ;;  %528 = vst [vmem:[%s3403_s11 + $0x48] sm:$0xff] %v527_v44  ;;  %v533_v47 = vld [vmem:[%s3407_s8 + $0x64] sm:$0xff]  ;;  %s580_s18 = scalar_lea.vmem %s3579_s13, %s2747_s20   ;;  %s581_s19 = scalar_lea.vmem %s3583_s16, %s2747_s20 [#allocation2]  }
  0x74   : >> { %530 = vst [vmem:[%s3403_s11 + $0x50] sm:$0xff] %v529_v45  ;;  %532 = vst [vmem:[%s3403_s11 + $0x58] sm:$0xff] %v531_v46  ;;  %v535_v48 = vld [vmem:[%s3407_s8 + $0x6c] sm:$0xff]  ;;  %v537_v49 = vld [vmem:[%s3407_s8 + $0x74] sm:$0xff] }
  0x75   : >> { %534 = vst [vmem:[%s3403_s11 + $0x60] sm:$0xff] %v533_v47  ;;  %536 = vst [vmem:[%s3403_s11 + $0x68] sm:$0xff] %v535_v48  ;;  %v539_v50 = vld [vmem:[%s3407_s8 + $0x7c] sm:$0xff]  ;;  %v541_v51 = vld [vmem:[%s3407_s8 + $0x84] sm:$0xff] }
  0x76   : >> { %538 = vst [vmem:[%s3403_s11 + $0x70] sm:$0xff] %v537_v49  ;;  %v543_v52 = vld [vmem:[%s3407_s8 + $0x8c] sm:$0xff]  ;;  %540 = vst [vmem:[%s3403_s11 + $0x78] sm:$0xff] %v539_v50  ;;  %v545_v53 = vld [vmem:[%s3407_s8 + $0x94] sm:$0xff] }
  0x77   : >> { %542 = vst [vmem:[%s3403_s11 + $0x80] sm:$0xff] %v541_v51  ;;  %544 = vst [vmem:[%s3403_s11 + $0x88] sm:$0xff] %v543_v52  ;;  %v547_v54 = vld [vmem:[%s3407_s8 + $0x9c] sm:$0xff]  ;;  %v549_v55 = vld [vmem:[%s3407_s8 + $0xa4] sm:$0xff] }
  0x78   : >> { %546 = vst [vmem:[%s3403_s11 + $0x90] sm:$0xff] %v545_v53  ;;  %548 = vst [vmem:[%s3403_s11 + $0x98] sm:$0xff] %v547_v54  ;;  %v551_v56 = vld [vmem:[%s3407_s8 + $0xac] sm:$0xff]  ;;  %v553_v57 = vld [vmem:[%s3407_s8 + $0xb4] sm:$0xff] }
  0x79   : >> { %550 = vst [vmem:[%s3403_s11 + $0xa0] sm:$0xff] %v549_v55  ;;  %v555_v58 = vld [vmem:[%s3407_s8 + $0xbc] sm:$0xff]  ;;  %552 = vst [vmem:[%s3403_s11 + $0xa8] sm:$0xff] %v551_v56  ;;  %v557_v59 = vld [vmem:[%s3407_s8 + $0xc4] sm:$0xff]  ;;  %443 = sbr.rel (!%p440_p7) target bundleno = 110 (0x6e), region = 269 }
  0x7a   : >> { %554 = vst [vmem:[%s3403_s11 + $0xb0] sm:$0xff] %v553_v57  ;;  %556 = vst [vmem:[%s3403_s11 + $0xb8] sm:$0xff] %v555_v58  ;;  %v559_v60 = vld [vmem:[%s3407_s8 + $0xcc] sm:$0xff]  ;;  %v561_v61 = vld [vmem:[%s3407_s8 + $0xd4] sm:$0xff] }
  0x7b   : >> { %558 = vst [vmem:[%s3403_s11 + $0xc0] sm:$0xff] %v557_v59  ;;  %560 = vst [vmem:[%s3403_s11 + $0xc8] sm:$0xff] %v559_v60  ;;  %v563_v62 = vld [vmem:[%s3407_s8 + $0xdc] sm:$0xff]  ;;  %v565_v63 = vld [vmem:[%s3407_s8 + $0xe4] sm:$0xff] }
  0x7c   : >> { %562 = vst [vmem:[%s3403_s11 + $0xd0] sm:$0xff] %v561_v61  ;;  %v567_v0 = vld [vmem:[%s3407_s8 + $0xec] sm:$0xff]  ;;  %564 = vst [vmem:[%s3403_s11 + $0xd8] sm:$0xff] %v563_v62  ;;  %v569_v1 = vld [vmem:[%s3407_s8 + $0xf4] sm:$0xff] }
  0x7d   : >> { %566 = vst [vmem:[%s3403_s11 + $0xe0] sm:$0xff] %v565_v63  ;;  %568 = vst [vmem:[%s3403_s11 + $0xe8] sm:$0xff] %v567_v0  ;;  %v571_v2 = vld [vmem:[%s3407_s8 + $0xfc] sm:$0xff]  ;;  %v573_v3 = vld [vmem:[%s3407_s8 + $0x104] sm:$0xff]  ;;  %s4702_s8 = smov %s580_s18 }
  0x7e   : >> { %570 = vst [vmem:[%s3403_s11 + $0xf0] sm:$0xff] %v569_v1  ;;  %572 = vst [vmem:[%s3403_s11 + $0xf8] sm:$0xff] %v571_v2 }
  0x7f   : >> { %574 = vst [vmem:[%s3403_s11 + $0x100] sm:$0xff] %v573_v3  ;;  %s4701_s11 = smov %s581_s19 }
  0x80 PF: > { %s3841_s26 = sand.u32 31, %s434_s27   ;;  %s2856_s20 = sshll.u32 %s3730_s7, 12 }
  0x81   : > { %s586_s24 = sshra.s32 %s2856_s20, 4  ;;  %p2752_p8 = scmp.le.s32.totalorder %s3841_s26, 0 }
  0x82   : > { %s3845_s0 = scalar_lea.vmem %s3579_s13, %s586_s24   ;;  %s590_s19 = scalar_lea.vmem %s3583_s16, %s586_s24 [#allocation2]  }
  0x83   : > { %2640 = sbr.rel (%p2752_p8) target bundleno = 148 (0x94), region = 274  ;;  %s3417_s9 = smov (!%p2752_p8), %s590_s19  }
  0x84   : > { %s3421_s30 = smov (!%p2752_p8), %s3845_s0   ;;  %s3425_s18 = smov (!%p2752_p8), 0  }
  0x85   : > { %s3429_s11 = smov (!%p2752_p8), 0  }
  0x8a LB: >> { %v602_v4 = vld [vmem:[%s3423_s30] sm:$0xff]  ;;  %v604_v5 = vld [vmem:[%s3423_s30 + $0xc] sm:$0xff]  ;;  %s606_s27 = sadd.s32 1, %s3427_s18  ;;  %s596_s11 = sadd.s32 1, %s3431_s11   ;;  %s3431_s11 = sphi %s3429_s11, %s596_s11   ;;  %s3427_s18 = sphi %s3425_s18, %s3426_s18   ;;  %s3423_s30 = sphi %s3421_s30, %s611_s30   ;;  %s3419_s9 = sphi %s3417_s9, %s612_s9  }
  0x8b   : >> { %603 = vst [vmem:[%s3419_s9] sm:$0xff] %v602_v4  ;;  %605 = vst [vmem:[%s3419_s9 + $0x8] sm:$0xff] %v604_v5  ;;  %p607_p9 = scmp.ge.s32.totalorder %s606_s27, %s3841_s26  ;;  %p595_p10 = scmp.ge.s32.totalorder %s596_s11, %s3841_s26 }
  0x8d   : >> { %s4727_s27 = smov (%p607_p9, %s606_s27), 0  ;;  %598 = sbr.rel (!%p595_p10) target bundleno = 138 (0x8a), region = 280 }
  0x8e   : >> { %s2753_s24 = sshll.u32 %s4727_s27, 3  ;;  %s3426_s18 = smov %s4727_s27  }
  0x8f   : >> { %s611_s30 = scalar_lea.vmem %s3845_s0, %s2753_s24   ;;  %s612_s9 = scalar_lea.vmem %s590_s19, %s2753_s24 [#allocation2]  }
  0x94 PF: > { %s3497_s7 = smov 0  }
  0x95   : > { %s613_s8 = sshllo.u32 %s3497_s7, %s3587_s17 }
  0x96   : > { %v622_v6 = vld [vmem:[%s3723_s12] sm:%s613_s8]  ;;  %v624_v7 = vld [vmem:[%s3723_s12 + $0xc] sm:%s613_s8] }
  0x97   : > { %623 = vst [vmem:[%s3726_s14] sm:%s613_s8] %v622_v6  ;;  %625 = vst [vmem:[%s3726_s14 + $0x8] sm:%s613_s8] %v624_v7 }
  0x98 PF: > { %p2755_p11 = scmp.ge.u32.totalorder %s3581_s15, 8 }
  0x99   : > { %s3498_s10 = smov (!%p2755_p11), 0  }
  0x9a   : > { %228 = sbr.rel (%p2755_p11) target bundleno = 161 (0xa1), region = 52  ;;  %s229_s0 = sshllo.u32 (!%p2755_p11), %s3498_s10, %s3581_s15 }
  0x9b   : > { %v238_v8 = vld [vmem:[%s3579_s13] sm:%s229_s0] (!%p2755_p11)  ;;  %v240_v9 = vld [vmem:[%s3579_s13 + $0xc] sm:%s229_s0] (!%p2755_p11) }
  0x9c   : > { %239 = vst [vmem:[%s3583_s16] sm:%s229_s0] (!%p2755_p11), %v238_v8  ;;  %241 = vst [vmem:[%s3583_s16 + $0x8] sm:%s229_s0] (!%p2755_p11), %v240_v9 }
  0xa1 PF: > { %p2756_p12 = scmp.ge.s32.totalorder %s3367_s23, 1  ;;  %p628_p13 = scmp.lt.s32.totalorder %s3367_s23, 3 }
  0xa3   : > { %p629_p0 = pnand %p2756_p12, %p628_p13 }
  0xa4   : > { %s635_s17 = sand.u32 (!%p629_p0), 1, %s3359_s21   ;;  %v3499_v10 = vmov (!%p629_p0), 0   ;;  %v3153_v13 = vld [vmem:[%s4684_s1] sm:$0xff] (!%p629_p0)   ;;  %v710_v15 = vld [vmem:[%s4685_s2 + $0x10] sm:$0xff] (!%p629_p0)  ;;  %vm990_vm0 = vcmask (!%p629_p0), 130048   ;;  %v709_v16 = vld [vmem:[%s4685_s2 + $0x8] sm:$0xff] (!%p629_p0) }
  0xa5   : > { %632 = sbr.rel (%p629_p0) target bundleno = 1247 (0x4df), region = 106  ;;  %s2757_s12 = sshll.u32 (!%p629_p0), %s635_s17, 4  ;;  %1071 = vmatprep.mubr.bf16.mxu0 (!%p629_p0), %v3499_v10  ;;  %3148 = vset.pattern.permute.xlu0 (!%p629_p0), %v3499_v10  ;;  %v708_v14 = vld [vmem:[%s4685_s2] sm:$0xff] (!%p629_p0)  ;;  %v711_v17 = vld [vmem:[%s4685_s2 + $0x18] sm:$0xff] (!%p629_p0)  ;;  %v713_v19 = vld [vmem:[%s4685_s2 + $0x28] sm:$0xff] (!%p629_p0) }
  0xa6   : > { %3149 = vset.pattern.permute.xlu1 (!%p629_p0), %v3499_v10  ;;  %s637_s13 = scalar_lea.vmem (!%p629_p0), [#allocation2], %s2757_s12  ;;  %742 = vperm.xlu0 (!%p629_p0), %3148, %v708_v14   ;;  %v712_v18 = vld [vmem:[%s4685_s2 + $0x20] sm:$0xff] (!%p629_p0)  ;;  %v3154_v20 = vld [vmem:[%s4684_s1 + $0x8] sm:$0xff] (!%p629_p0)   ;;  %v714_v21 = vld [vmem:[%s4685_s2 + $0x30] sm:$0xff] (!%p629_p0)  ;;  %s2758_s27 = sshll.u32 (!%p629_p0), %s635_s17, 1 }
  0xa7   : > { %v3150_v11 = vld [vmem:[%s637_s13 + $0x4] ss:$8 sps:$4 sm:$0xff] (!%p629_p0)   ;;  %v3152_v12 = vld [vmem:[%s637_s13] ss:$8 sps:$4 sm:$0xff] (!%p629_p0)   ;;  %752 = vperm.xlu1 (!%p629_p0), %3149, %v710_v15   ;;  %s4257_s24 = scalar_lea.vmem (!%p629_p0), [#allocation3], %s2758_s27  }
  0xa8   : > { %1039 = vmatprep.subr.bf16.mxu0 (!%p629_p0), %v3150_v11  ;;  %v715_v22 = vld [vmem:[%s4685_s2 + $0x38] sm:$0xff] (!%p629_p0)  ;;  %v716_v23 = vld [vmem:[%s4685_s2 + $0x40] sm:$0xff] (!%p629_p0)  ;;  %v717_v24 = vld [vmem:[%s4685_s2 + $0x48] sm:$0xff] (!%p629_p0) }
  0xa9   : > { %1040 = vmatpush1.bf16.msra.mxu0 (!%p629_p0), %v3152_v12  ;;  %v3155_v25 = vld [vmem:[%s4684_s1 + $0x10] sm:$0xff] (!%p629_p0)   ;;  %v719_v27 = vld [vmem:[%s4685_s2 + $0x58] sm:$0xff] (!%p629_p0)  ;;  %v720_v28 = vld [vmem:[%s4685_s2 + $0x60] sm:$0xff] (!%p629_p0) }
  0xaa   : > { %747 = vperm.xlu0 (!%p629_p0), %3148, %v709_v16   ;;  %v718_v26 = vld [vmem:[%s4685_s2 + $0x50] sm:$0xff] (!%p629_p0)  ;;  %v721_v29 = vld [vmem:[%s4685_s2 + $0x68] sm:$0xff] (!%p629_p0)  ;;  %v3156_v30 = vld [vmem:[%s4684_s1 + $0x18] sm:$0xff] (!%p629_p0)  }
  0xab   : > { %757 = vperm.xlu1 (!%p629_p0), %3149, %v711_v17   ;;  %v722_v31 = vld [vmem:[%s4685_s2 + $0x70] sm:$0xff] (!%p629_p0)  ;;  %v723_v32 = vld [vmem:[%s4685_s2 + $0x78] sm:$0xff] (!%p629_p0)  ;;  %v724_v33 = vld [vmem:[%s4685_s2 + $0x80] sm:$0xff] (!%p629_p0) }
  0xac   : > { %2777 = vmatmul.mubr.msk.bf16.vlgmr.msra.gmra.mrb[0].mxu0 %vm990_vm0, %v3153_v13  ;;  %v725_v34 = vld [vmem:[%s4685_s2 + $0x88] sm:$0xff]  ;;  %v3157_v35 = vld [vmem:[%s4684_s1 + $0x20] sm:$0xff]   ;;  %v726_v36 = vld [vmem:[%s4685_s2 + $0x90] sm:$0xff]  ;;  %s4704_s7 = sadd.s32 (%p3568_p5), 4294967295, %s3367_s23  }
  0xad   : > { %1081 = vmatprep.mubr.bf16.mxu0 %v3499_v10  ;;  %v727_v37 = vld [vmem:[%s4685_s2 + $0x98] sm:$0xff]  ;;  %v728_v38 = vld [vmem:[%s4685_s2 + $0xa0] sm:$0xff]  ;;  %v729_v39 = vld [vmem:[%s4685_s2 + $0xa8] sm:$0xff]  ;;  %s2827_s21 = sshll.u32 (%p3568_p5), %s4704_s7, 1 }
  0xae   : > { %762 = vperm.xlu0 %3148, %v712_v18   ;;  %v3158_v40 = vld [vmem:[%s4684_s1 + $0x28] sm:$0xff]   ;;  %v730_v41 = vld [vmem:[%s4685_s2 + $0xb0] sm:$0xff]  ;;  %v731_v42 = vld [vmem:[%s4685_s2 + $0xb8] sm:$0xff]  ;;  %s2099_s17 = ssub.s32 (%p3568_p5), 3, %s2827_s21  ;;  %s4267_s0 = scalar_lea.vmem (%p3568_p5), %s4689_s6, %s2827_s21  }
  0xaf   : > { %767 = vperm.xlu1 %3149, %v713_v19   ;;  %v732_v43 = vld [vmem:[%s4685_s2 + $0xc0] sm:$0xff]  ;;  %v733_v44 = vld [vmem:[%s4685_s2 + $0xc8] sm:$0xff]  ;;  %v3159_v45 = vld [vmem:[%s4684_s1 + $0x30] sm:$0xff]   ;;  %p2100_p1 = scmp.lt.s32.totalorder (%p3568_p5), %s2099_s17, 2 }
  0xb0   : > { %v734_v46 = vld [vmem:[%s4685_s2 + $0xd0] sm:$0xff]  ;;  %v735_v47 = vld [vmem:[%s4685_s2 + $0xd8] sm:$0xff]  ;;  %v736_v48 = vld [vmem:[%s4685_s2 + $0xe0] sm:$0xff] }
  0xb1   : > { %v737_v49 = vld [vmem:[%s4685_s2 + $0xe8] sm:$0xff]  ;;  %v3160_v50 = vld [vmem:[%s4684_s1 + $0x38] sm:$0xff]   ;;  %v738_v51 = vld [vmem:[%s4685_s2 + $0xf0] sm:$0xff] }
  0xb2   : > { %772 = vperm.xlu0 %3148, %v714_v21   ;;  %v739_v52 = vld [vmem:[%s4685_s2 + $0xf8] sm:$0xff]  ;;  %v1360_v53 = vld [vmem:[%s4687_s4] sm:$0xff]  ;;  %v1361_v54 = vld [vmem:[%s4687_s4 + $0x8] sm:$0xff] }
  0xb3   : > { %777 = vperm.xlu1 %3149, %v715_v22   ;;  %v3161_v55 = vld [vmem:[%s4684_s1 + $0x40] sm:$0xff]   ;;  %v1362_v56 = vld [vmem:[%s4687_s4 + $0x10] sm:$0xff]  ;;  %v1363_v57 = vld [vmem:[%s4687_s4 + $0x18] sm:$0xff] }
  0xb4   : > { %2778 = vmatmul.mubr.msk.bf16.gmra.mrb[4].mxu0 %vm990_vm0, %v3154_v20  ;;  %v1364_v58 = vld [vmem:[%s4687_s4 + $0x20] sm:$0xff]  ;;  %v1365_v59 = vld [vmem:[%s4687_s4 + $0x28] sm:$0xff]  ;;  %v1366_v61 = vld [vmem:[%s4687_s4 + $0x30] sm:$0xff] }
  0xb5   : > { %1091 = vmatprep.mubr.bf16.mxu0 %v3499_v10  ;;  %v3162_v60 = vld [vmem:[%s4684_s1 + $0x48] sm:$0xff]   ;;  %v1367_v62 = vld [vmem:[%s4687_s4 + $0x38] sm:$0xff]  ;;  %v1368_v63 = vld [vmem:[%s4687_s4 + $0x40] sm:$0xff] }
  0xb6   : > { %782 = vperm.xlu0 %3148, %v716_v23   ;;  %v1369_v0 = vld [vmem:[%s4687_s4 + $0x48] sm:$0xff]  ;;  %v3163_v1 = vld [vmem:[%s4684_s1 + $0x50] sm:$0xff]   ;;  %v1371_v3 = vld [vmem:[%s4687_s4 + $0x58] sm:$0xff] }
  0xb7   : > { %787 = vperm.xlu1 %3149, %v717_v24   ;;  %v1370_v2 = vld [vmem:[%s4687_s4 + $0x50] sm:$0xff]  ;;  %v1372_v4 = vld [vmem:[%s4687_s4 + $0x60] sm:$0xff]  ;;  %v1373_v5 = vld [vmem:[%s4687_s4 + $0x68] sm:$0xff] }
  0xb8   : > { %v3164_v6 = vld [vmem:[%s4684_s1 + $0x58] sm:$0xff]   ;;  %v1374_v7 = vld [vmem:[%s4687_s4 + $0x70] sm:$0xff]  ;;  %v1376_v9 = vld [vmem:[%s4687_s4 + $0x80] sm:$0xff] }
  0xb9   : > { %v1375_v8 = vld [vmem:[%s4687_s4 + $0x78] sm:$0xff]  ;;  %v1377_v11 = vld [vmem:[%s4687_s4 + $0x88] sm:$0xff]  ;;  %v3165_v12 = vld [vmem:[%s4684_s1 + $0x60] sm:$0xff]  }
  0xba   : > { %792 = vperm.xlu0 %3148, %v718_v26   ;;  %v1378_v13 = vld [vmem:[%s4687_s4 + $0x90] sm:$0xff]  ;;  %v1379_v14 = vld [vmem:[%s4687_s4 + $0x98] sm:$0xff]  ;;  %v1380_v15 = vld [vmem:[%s4687_s4 + $0xa0] sm:$0xff] }
  0xbb   : > { %797 = vperm.xlu1 %3149, %v719_v27   ;;  %v1381_v16 = vld [vmem:[%s4687_s4 + $0xa8] sm:$0xff]  ;;  %v1382_v18 = vld [vmem:[%s4687_s4 + $0xb0] sm:$0xff]  ;;  %v1383_v19 = vld [vmem:[%s4687_s4 + $0xb8] sm:$0xff] }
  0xbc   : > { %2779 = vmatmul.mubr.msk.bf16.gmra.mrb[8].mxu0 %vm990_vm0, %v3155_v25  ;;  %v3166_v17 = vld [vmem:[%s4684_s1 + $0x68] sm:$0xff]   ;;  %v1384_v20 = vld [vmem:[%s4687_s4 + $0xc0] sm:$0xff]  ;;  %v3167_v22 = vld [vmem:[%s4684_s1 + $0x70] sm:$0xff]  }
  0xbd   : > { %1101 = vmatprep.mubr.bf16.mxu0 %v3499_v10  ;;  %v1385_v21 = vld [vmem:[%s4687_s4 + $0xc8] sm:$0xff]  ;;  %v1386_v23 = vld [vmem:[%s4687_s4 + $0xd0] sm:$0xff]  ;;  %v1387_v24 = vld [vmem:[%s4687_s4 + $0xd8] sm:$0xff] }
  0xbe   : > { %802 = vperm.xlu0 %3148, %v720_v28   ;;  %v1388_v25 = vld [vmem:[%s4687_s4 + $0xe0] sm:$0xff]  ;;  %v1389_v26 = vld [vmem:[%s4687_s4 + $0xe8] sm:$0xff]  ;;  %v3168_v27 = vld [vmem:[%s4684_s1 + $0x78] sm:$0xff]  }
  0xbf   : > { %807 = vperm.xlu1 %3149, %v721_v29   ;;  %v1391_v28 = vld [vmem:[%s4687_s4 + $0xf8] sm:$0xff] }
  0xc2   : > { %812 = vperm.xlu0 %3148, %v722_v31  }
  0xc3   : > { %817 = vperm.xlu1 %3149, %v723_v32  }
  0xc4   : > { %2780 = vmatmul.mubr.msk.bf16.gmra.mrb[12].mxu0 %vm990_vm0, %v3156_v30 }
  0xc5   : > { %1111 = vmatprep.mubr.bf16.mxu0 %v3499_v10 }
  0xc6   : > { %822 = vperm.xlu0 %3148, %v724_v33  }
  0xc7   : > { %827 = vperm.xlu1 %3149, %v725_v34  }
  0xca   : > { %832 = vperm.xlu0 %3148, %v726_v36  }
  0xcb   : > { %837 = vperm.xlu1 %3149, %v727_v37  }
  0xcc   : > { %2781 = vmatmul.mubr.msk.bf16.gmra.mrb[16].mxu0 %vm990_vm0, %v3157_v35 }
  0xcd   : > { %1121 = vmatprep.mubr.bf16.mxu0 %v3499_v10 }
  0xce   : > { %842 = vperm.xlu0 %3148, %v728_v38   ;;  %v3171_v38 = vld [vmem:[%s4686_s3 + $0x4] ss:$8 sps:$4 sm:$0xff]  }
  0xcf   : > { %847 = vperm.xlu1 %3149, %v729_v39   ;;  %1744 = vmatprep.mubr.bf16.mxu1 %v3171_v38 }
  0xd2   : > { %852 = vperm.xlu0 %3148, %v730_v41  }
  0xd3   : > { %857 = vperm.xlu1 %3149, %v731_v42  }
  0xd4   : > { %2782 = vmatmul.mubr.msk.bf16.gmra.mrb[20].mxu0 %vm990_vm0, %v3158_v40 }
  0xd5   : > { %1131 = vmatprep.mubr.bf16.mxu0 %v3499_v10 }
  0xd6   : > { %862 = vperm.xlu0 %3148, %v732_v43  }
  0xd7   : > { %867 = vperm.xlu1 %3149, %v733_v44  }
  0xda   : > { %872 = vperm.xlu0 %3148, %v734_v46  }
  0xdb   : > { %877 = vperm.xlu1 %3149, %v735_v47  }
  0xdc   : > { %2783 = vmatmul.mubr.msk.bf16.gmra.mrb[24].mxu0 %vm990_vm0, %v3159_v45 }
  0xdd   : > { %1141 = vmatprep.mubr.bf16.mxu0 %v3499_v10 }
  0xde   : > { %882 = vperm.xlu0 %3148, %v736_v48  }
  0xdf   : > { %887 = vperm.xlu1 %3149, %v737_v49  }
  0xe2   : > { %892 = vperm.xlu0 %3148, %v738_v51  }
  0xe3   : > { %897 = vperm.xlu1 %3149, %v739_v52  }
  0xe4   : > { %2784 = vmatmul.mubr.msk.bf16.gmra.mrb[28].mxu0 %vm990_vm0, %v3160_v50 }
  0xe5   : > { %1151 = vmatprep.mubr.bf16.mxu0 %v3499_v10 }
  0xe6   : > { %1394 = vperm.xlu0 %3148, %v1360_v53  }
  0xe7   : > { %1399 = vperm.xlu1 %3149, %v1361_v54  }
  0xea   : > { %1404 = vperm.xlu0 %3148, %v1362_v56  }
  0xeb   : > { %1409 = vperm.xlu1 %3149, %v1363_v57  }
  0xec   : > { %2785 = vmatmul.mubr.msk.bf16.gmra.mrb[32].mxu0 %vm990_vm0, %v3161_v55 }
  0xed   : > { %1161 = vmatprep.mubr.bf16.mxu0 %v3499_v10 }
  0xee   : > { %1414 = vperm.xlu0 %3148, %v1364_v58  }
  0xef   : > { %1419 = vperm.xlu1 %3149, %v1365_v59  }
  0xf2   : > { %1424 = vperm.xlu0 %3148, %v1366_v61  }
  0xf3   : > { %1429 = vperm.xlu1 %3149, %v1367_v62  }
  0xf4   : > { %2786 = vmatmul.mubr.msk.bf16.gmra.mrb[36].mxu0 %vm990_vm0, %v3162_v60 }
  0xf5   : > { %1171 = vmatprep.mubr.bf16.mxu0 %v3499_v10 }
  0xf6   : > { %1434 = vperm.xlu0 %3148, %v1368_v63  }
  0xf7   : > { %1439 = vperm.xlu1 %3149, %v1369_v0  }
  0xfa   : > { %1444 = vperm.xlu0 %3148, %v1370_v2  }
  0xfb   : > { %1449 = vperm.xlu1 %3149, %v1371_v3  }
  0xfc   : > { %2787 = vmatmul.mubr.msk.bf16.gmra.mrb[40].mxu0 %vm990_vm0, %v3163_v1 }
  0xfd   : > { %1181 = vmatprep.mubr.bf16.mxu0 %v3499_v10 }
  0xfe   : > { %1454 = vperm.xlu0 %3148, %v1372_v4  }
  0xff   : > { %1459 = vperm.xlu1 %3149, %v1373_v5  }
 0x102   : > { %1464 = vperm.xlu0 %3148, %v1374_v7  }
 0x103   : > { %1469 = vperm.xlu1 %3149, %v1375_v8  }
 0x104   : > { %2788 = vmatmul.mubr.msk.bf16.gmra.mrb[44].mxu0 %vm990_vm0, %v3164_v6 }
 0x105   : > { %1191 = vmatprep.mubr.bf16.mxu0 %v3499_v10 }
 0x106   : > { %1474 = vperm.xlu0 %3148, %v1376_v9  }
 0x107   : > { %1479 = vperm.xlu1 %3149, %v1377_v11  }
 0x10a   : > { %1484 = vperm.xlu0 %3148, %v1378_v13  }
 0x10b   : > { %1489 = vperm.xlu1 %3149, %v1379_v14  }
 0x10c   : > { %2789 = vmatmul.mubr.msk.bf16.gmra.mrb[48].mxu0 %vm990_vm0, %v3165_v12 }
 0x10d   : > { %1201 = vmatprep.mubr.bf16.mxu0 %v3499_v10 }
 0x10e   : > { %1494 = vperm.xlu0 %3148, %v1380_v15  }
 0x10f   : > { %1499 = vperm.xlu1 %3149, %v1381_v16  }
 0x112   : > { %1504 = vperm.xlu0 %3148, %v1382_v18  }
 0x113   : > { %1509 = vperm.xlu1 %3149, %v1383_v19  }
 0x114   : > { %2790 = vmatmul.mubr.msk.bf16.gmra.mrb[52].mxu0 %vm990_vm0, %v3166_v17 }
 0x115   : > { %1211 = vmatprep.mubr.bf16.mxu0 %v3499_v10 }
 0x116   : > { %1514 = vperm.xlu0 %3148, %v1384_v20  }
 0x117   : > { %1519 = vperm.xlu1 %3149, %v1385_v21  }
 0x11a   : > { %1524 = vperm.xlu0 %3148, %v1386_v23  }
 0x11b   : > { %1529 = vperm.xlu1 %3149, %v1387_v24  }
 0x11c   : > { %2791 = vmatmul.mubr.msk.bf16.gmra.mrb[56].mxu0 %vm990_vm0, %v3167_v22 }
 0x11d   : > { %1221 = vmatprep.mubr.bf16.mxu0 %v3499_v10  ;;  %v1390_v10 = vld [vmem:[%s4687_s4 + $0xf0] sm:$0xff] }
 0x11e   : > { %1534 = vperm.xlu0 %3148, %v1388_v25  }
 0x11f   : > { %1539 = vperm.xlu1 %3149, %v1389_v26  }
 0x122   : > { %1544 = vperm.xlu0 %3148, %v1390_v10  }
 0x123   : > { %1549 = vperm.xlu1 %3149, %v1391_v28  }
 0x124   : > { %2792 = vmatmul.mubr.msk.bf16.gmra.mrb[60].mxu0 %vm990_vm0, %v3168_v27 }
 0x125   : > { %v743_v29 = vpop.permute.xlu0 %742 }
 0x126   : > { %v753_v39 = vpop.permute.xlu1 %752 }
 0x129   : > { %v748_v33 = vpop.permute.xlu0 %747 }
 0x12a   : > { %v758_v50 = vpop.permute.xlu1 %757 }
 0x12d   : > { %v763_v61 = vpop.permute.xlu0 %762 }
 0x12e   : > { %v768_v2 = vpop.permute.xlu1 %767 }
 0x131   : > { %v773_v14 = vpop.permute.xlu0 %772 }
 0x132   : > { %v778_v19 = vpop.permute.xlu1 %777 }
 0x17f   : > { %v1073_v30 = vpop.f32.mrb[0].mxu0 }
 0x180   : > { %v1074_v31 = vadd.f32 %v1073_v30, %v743_v29  ;;  %v1075_v32 = vpop.f32.mrb[1].mxu0 }
 0x181   : > { %v1076_v34 = vadd.f32 %v1075_v32, %v743_v29  ;;  %v1077_v35 = vpop.f32.mrb[2].mxu0  ;;  %v783_v29 = vpop.permute.xlu0 %782 }
 0x182   : > { %v1078_v36 = vadd.f32 %v1077_v35, %v748_v33  ;;  %v1079_v37 = vpop.f32.mrb[3].mxu0  ;;  %v1232_v41 = vmax.f32 %v1074_v31, 0.0 }
 0x183   : > { %v1080_v40 = vadd.f32 %v1079_v37, %v748_v33  ;;  %v1233_v43 = vmax.f32 %v1076_v34, 0.0  ;;  %v788_v34 = vpop.permute.xlu1 %787 }
 0x184   : > { %v1234_v42 = vmax.f32 %v1078_v36, 0.0 }
 0x185   : > { %v1235_v44 = vmax.f32 %v1080_v40, 0.0 }
 0x186   : > { %v1296_v45 = vpack.c.bf16 %v1234_v42, %v1232_v41 }
 0x187   : > { %v1083_v46 = vpop.f32.mrb[4].mxu0  ;;  %v1297_v47 = vpack.c.bf16 %v1235_v44, %v1233_v43 }
 0x188   : > { %v1084_v48 = vadd.f32 %v1083_v46, %v753_v39  ;;  %v1085_v49 = vpop.f32.mrb[5].mxu0 }
 0x189   : > { %v1086_v51 = vadd.f32 %v1085_v49, %v753_v39  ;;  %v1087_v52 = vpop.f32.mrb[6].mxu0  ;;  %1712 = vmatprep.subr.bf16.mxu1 %v1297_v47 }
 0x18a   : > { %v1088_v53 = vadd.f32 %v1087_v52, %v758_v50  ;;  %v1089_v54 = vpop.f32.mrb[7].mxu0  ;;  %1713 = vmatpush1.bf16.msra.mxu1 %v1296_v45  ;;  %v1236_v56 = vmax.f32 %v1084_v48, 0.0  ;;  %v793_v45 = vpop.permute.xlu0 %792 }
 0x18b   : > { %v1090_v55 = vadd.f32 %v1089_v54, %v758_v50  ;;  %v1237_v58 = vmax.f32 %v1086_v51, 0.0  ;;  %v798_v50 = vpop.permute.xlu1 %797 }
 0x18c   : > { %v1238_v57 = vmax.f32 %v1088_v53, 0.0 }
 0x18d   : > { %v1239_v59 = vmax.f32 %v1090_v55, 0.0 }
 0x18e   : > { %v1298_v60 = vpack.c.bf16 %v1238_v57, %v1236_v56 }
 0x18f   : > { %v1299_v62 = vpack.c.bf16 %v1239_v59, %v1237_v58  ;;  %v1093_v63 = vpop.f32.mrb[8].mxu0 }
 0x190   : > { %v1094_v0 = vadd.f32 %v1093_v63, %v763_v61  ;;  %v1095_v1 = vpop.f32.mrb[9].mxu0 }
 0x191   : > { %v1096_v3 = vadd.f32 %v1095_v1, %v763_v61  ;;  %v1097_v4 = vpop.f32.mrb[10].mxu0  ;;  %1714 = vmatprep.subr.bf16.mxu1 %v1299_v62  ;;  %v803_v61 = vpop.permute.xlu0 %802 }
 0x192   : > { %v1098_v5 = vadd.f32 %v1097_v4, %v768_v2  ;;  %v1099_v6 = vpop.f32.mrb[11].mxu0  ;;  %1715 = vmatpush1.bf16.msra.mxu1 %v1298_v60  ;;  %v1240_v8 = vmax.f32 %v1094_v0, 0.0 }
 0x193   : > { %v1100_v7 = vadd.f32 %v1099_v6, %v768_v2  ;;  %v1241_v11 = vmax.f32 %v1096_v3, 0.0  ;;  %v808_v2 = vpop.permute.xlu1 %807 }
 0x194   : > { %v1242_v9 = vmax.f32 %v1098_v5, 0.0 }
 0x195   : > { %v1243_v12 = vmax.f32 %v1100_v7, 0.0 }
 0x196   : > { %v1300_v13 = vpack.c.bf16 %v1242_v9, %v1240_v8 }
 0x197   : > { %v1301_v15 = vpack.c.bf16 %v1243_v12, %v1241_v11  ;;  %v1103_v16 = vpop.f32.mrb[12].mxu0 }
 0x198   : > { %v1104_v17 = vadd.f32 %v1103_v16, %v773_v14  ;;  %v1105_v18 = vpop.f32.mrb[13].mxu0 }
 0x199   : > { %v1106_v20 = vadd.f32 %v1105_v18, %v773_v14  ;;  %v1107_v21 = vpop.f32.mrb[14].mxu0  ;;  %1716 = vmatprep.subr.bf16.mxu1 %v1301_v15  ;;  %v813_v14 = vpop.permute.xlu0 %812 }
 0x19a   : > { %v1108_v22 = vadd.f32 %v1107_v21, %v778_v19  ;;  %v1109_v23 = vpop.f32.mrb[15].mxu0  ;;  %1717 = vmatpush1.bf16.msra.mxu1 %v1300_v13  ;;  %v1244_v25 = vmax.f32 %v1104_v17, 0.0 }
 0x19b   : > { %v1110_v24 = vadd.f32 %v1109_v23, %v778_v19  ;;  %v1245_v27 = vmax.f32 %v1106_v20, 0.0  ;;  %v818_v19 = vpop.permute.xlu1 %817 }
 0x19c   : > { %v1246_v26 = vmax.f32 %v1108_v22, 0.0 }
 0x19d   : > { %v1247_v10 = vmax.f32 %v1110_v24, 0.0 }
 0x19e   : > { %v1302_v28 = vpack.c.bf16 %v1246_v26, %v1244_v25 }
 0x19f   : > { %v1303_v30 = vpack.c.bf16 %v1247_v10, %v1245_v27  ;;  %v1113_v31 = vpop.f32.mrb[16].mxu0 }
 0x1a0   : > { %v1114_v32 = vadd.f32 %v1113_v31, %v783_v29  ;;  %v1115_v33 = vpop.f32.mrb[17].mxu0 }
 0x1a1   : > { %v1116_v35 = vadd.f32 %v1115_v33, %v783_v29  ;;  %v1117_v36 = vpop.f32.mrb[18].mxu0  ;;  %1718 = vmatprep.subr.bf16.mxu1 %v1303_v30  ;;  %v823_v29 = vpop.permute.xlu0 %822 }
 0x1a2   : > { %v1118_v37 = vadd.f32 %v1117_v36, %v788_v34  ;;  %v1119_v38 = vpop.f32.mrb[19].mxu0  ;;  %1719 = vmatpush1.bf16.msra.mxu1 %v1302_v28  ;;  %v1248_v40 = vmax.f32 %v1114_v32, 0.0 }
 0x1a3   : > { %v1120_v39 = vadd.f32 %v1119_v38, %v788_v34  ;;  %v1249_v42 = vmax.f32 %v1116_v35, 0.0  ;;  %v828_v34 = vpop.permute.xlu1 %827 }
 0x1a4   : > { %v1250_v41 = vmax.f32 %v1118_v37, 0.0 }
 0x1a5   : > { %v1251_v43 = vmax.f32 %v1120_v39, 0.0 }
 0x1a6   : > { %v1304_v44 = vpack.c.bf16 %v1250_v41, %v1248_v40 }
 0x1a7   : > { %v1305_v46 = vpack.c.bf16 %v1251_v43, %v1249_v42  ;;  %v1123_v47 = vpop.f32.mrb[20].mxu0 }
 0x1a8   : > { %v1124_v48 = vadd.f32 %v1123_v47, %v793_v45  ;;  %v1125_v49 = vpop.f32.mrb[21].mxu0 }
 0x1a9   : > { %v1126_v51 = vadd.f32 %v1125_v49, %v793_v45  ;;  %v1127_v52 = vpop.f32.mrb[22].mxu0  ;;  %1720 = vmatprep.subr.bf16.mxu1 %v1305_v46  ;;  %v833_v45 = vpop.permute.xlu0 %832 }
 0x1aa   : > { %v1128_v53 = vadd.f32 %v1127_v52, %v798_v50  ;;  %v1129_v54 = vpop.f32.mrb[23].mxu0  ;;  %1721 = vmatpush1.bf16.msra.mxu1 %v1304_v44  ;;  %v1252_v56 = vmax.f32 %v1124_v48, 0.0 }
 0x1ab   : > { %v1130_v55 = vadd.f32 %v1129_v54, %v798_v50  ;;  %v1253_v58 = vmax.f32 %v1126_v51, 0.0  ;;  %v838_v50 = vpop.permute.xlu1 %837 }
 0x1ac   : > { %v1254_v57 = vmax.f32 %v1128_v53, 0.0 }
 0x1ad   : > { %v1255_v59 = vmax.f32 %v1130_v55, 0.0 }
 0x1ae   : > { %v1306_v60 = vpack.c.bf16 %v1254_v57, %v1252_v56 }
 0x1af   : > { %v1307_v62 = vpack.c.bf16 %v1255_v59, %v1253_v58  ;;  %v1133_v63 = vpop.f32.mrb[24].mxu0 }
 0x1b0   : > { %v1134_v0 = vadd.f32 %v1133_v63, %v803_v61  ;;  %v1135_v1 = vpop.f32.mrb[25].mxu0 }
 0x1b1   : > { %v1136_v3 = vadd.f32 %v1135_v1, %v803_v61  ;;  %v1137_v4 = vpop.f32.mrb[26].mxu0  ;;  %1722 = vmatprep.subr.bf16.mxu1 %v1307_v62  ;;  %v843_v61 = vpop.permute.xlu0 %842 }
 0x1b2   : > { %v1138_v5 = vadd.f32 %v1137_v4, %v808_v2  ;;  %v1139_v6 = vpop.f32.mrb[27].mxu0  ;;  %1723 = vmatpush1.bf16.msra.mxu1 %v1306_v60  ;;  %v1256_v8 = vmax.f32 %v1134_v0, 0.0 }
 0x1b3   : > { %v1140_v7 = vadd.f32 %v1139_v6, %v808_v2  ;;  %v1257_v11 = vmax.f32 %v1136_v3, 0.0  ;;  %v848_v2 = vpop.permute.xlu1 %847 }
 0x1b4   : > { %v1258_v9 = vmax.f32 %v1138_v5, 0.0 }
 0x1b5   : > { %v1259_v12 = vmax.f32 %v1140_v7, 0.0 }
 0x1b6   : > { %v1308_v13 = vpack.c.bf16 %v1258_v9, %v1256_v8 }
 0x1b7   : > { %v1309_v15 = vpack.c.bf16 %v1259_v12, %v1257_v11  ;;  %v1143_v16 = vpop.f32.mrb[28].mxu0 }
 0x1b8   : > { %v1144_v17 = vadd.f32 %v1143_v16, %v813_v14  ;;  %v1145_v18 = vpop.f32.mrb[29].mxu0 }
 0x1b9   : > { %v1146_v20 = vadd.f32 %v1145_v18, %v813_v14  ;;  %v1147_v21 = vpop.f32.mrb[30].mxu0  ;;  %1724 = vmatprep.subr.bf16.mxu1 %v1309_v15  ;;  %v853_v14 = vpop.permute.xlu0 %852 }
 0x1ba   : > { %v1148_v22 = vadd.f32 %v1147_v21, %v818_v19  ;;  %v1149_v23 = vpop.f32.mrb[31].mxu0  ;;  %1725 = vmatpush1.bf16.msra.mxu1 %v1308_v13  ;;  %v1260_v25 = vmax.f32 %v1144_v17, 0.0 }
 0x1bb   : > { %v1150_v24 = vadd.f32 %v1149_v23, %v818_v19  ;;  %v1261_v27 = vmax.f32 %v1146_v20, 0.0  ;;  %v858_v19 = vpop.permute.xlu1 %857 }
 0x1bc   : > { %v1262_v26 = vmax.f32 %v1148_v22, 0.0 }
 0x1bd   : > { %v1263_v10 = vmax.f32 %v1150_v24, 0.0 }
 0x1be   : > { %v1310_v28 = vpack.c.bf16 %v1262_v26, %v1260_v25 }
 0x1bf   : > { %v1311_v30 = vpack.c.bf16 %v1263_v10, %v1261_v27  ;;  %v1153_v31 = vpop.f32.mrb[32].mxu0 }
 0x1c0   : > { %v1154_v32 = vadd.f32 %v1153_v31, %v823_v29  ;;  %v1155_v33 = vpop.f32.mrb[33].mxu0 }
 0x1c1   : > { %v1156_v35 = vadd.f32 %v1155_v33, %v823_v29  ;;  %v1157_v36 = vpop.f32.mrb[34].mxu0  ;;  %1726 = vmatprep.subr.bf16.mxu1 %v1311_v30  ;;  %v863_v29 = vpop.permute.xlu0 %862 }
 0x1c2   : > { %v1158_v37 = vadd.f32 %v1157_v36, %v828_v34  ;;  %v1159_v38 = vpop.f32.mrb[35].mxu0  ;;  %1727 = vmatpush1.bf16.msra.mxu1 %v1310_v28  ;;  %v1264_v40 = vmax.f32 %v1154_v32, 0.0 }
 0x1c3   : > { %v1160_v39 = vadd.f32 %v1159_v38, %v828_v34  ;;  %v1265_v42 = vmax.f32 %v1156_v35, 0.0  ;;  %v868_v34 = vpop.permute.xlu1 %867 }
 0x1c4   : > { %v1266_v41 = vmax.f32 %v1158_v37, 0.0 }
 0x1c5   : > { %v1267_v43 = vmax.f32 %v1160_v39, 0.0 }
 0x1c6   : > { %v1312_v44 = vpack.c.bf16 %v1266_v41, %v1264_v40 }
 0x1c7   : > { %v1313_v46 = vpack.c.bf16 %v1267_v43, %v1265_v42  ;;  %v1163_v47 = vpop.f32.mrb[36].mxu0 }
 0x1c8   : > { %v1164_v48 = vadd.f32 %v1163_v47, %v833_v45  ;;  %v1165_v49 = vpop.f32.mrb[37].mxu0 }
 0x1c9   : > { %v1166_v51 = vadd.f32 %v1165_v49, %v833_v45  ;;  %v1167_v52 = vpop.f32.mrb[38].mxu0  ;;  %1728 = vmatprep.subr.bf16.mxu1 %v1313_v46  ;;  %v873_v45 = vpop.permute.xlu0 %872 }
 0x1ca   : > { %v1168_v53 = vadd.f32 %v1167_v52, %v838_v50  ;;  %v1169_v54 = vpop.f32.mrb[39].mxu0  ;;  %1729 = vmatpush1.bf16.msra.mxu1 %v1312_v44  ;;  %v1268_v56 = vmax.f32 %v1164_v48, 0.0 }
 0x1cb   : > { %v1170_v55 = vadd.f32 %v1169_v54, %v838_v50  ;;  %v1269_v58 = vmax.f32 %v1166_v51, 0.0  ;;  %v878_v50 = vpop.permute.xlu1 %877 }
 0x1cc   : > { %v1270_v57 = vmax.f32 %v1168_v53, 0.0 }
 0x1cd   : > { %v1271_v59 = vmax.f32 %v1170_v55, 0.0 }
 0x1ce   : > { %v1314_v60 = vpack.c.bf16 %v1270_v57, %v1268_v56 }
 0x1cf   : > { %v1315_v62 = vpack.c.bf16 %v1271_v59, %v1269_v58  ;;  %v1173_v63 = vpop.f32.mrb[40].mxu0 }
 0x1d0   : > { %v1174_v0 = vadd.f32 %v1173_v63, %v843_v61  ;;  %v1175_v1 = vpop.f32.mrb[41].mxu0 }
 0x1d1   : > { %v1176_v3 = vadd.f32 %v1175_v1, %v843_v61  ;;  %v1177_v4 = vpop.f32.mrb[42].mxu0  ;;  %1730 = vmatprep.subr.bf16.mxu1 %v1315_v62  ;;  %v883_v61 = vpop.permute.xlu0 %882 }
 0x1d2   : > { %v1178_v5 = vadd.f32 %v1177_v4, %v848_v2  ;;  %v1179_v6 = vpop.f32.mrb[43].mxu0  ;;  %1731 = vmatpush1.bf16.msra.mxu1 %v1314_v60  ;;  %v1272_v8 = vmax.f32 %v1174_v0, 0.0 }
 0x1d3   : > { %v1180_v7 = vadd.f32 %v1179_v6, %v848_v2  ;;  %v1273_v11 = vmax.f32 %v1176_v3, 0.0  ;;  %v888_v2 = vpop.permute.xlu1 %887 }
 0x1d4   : > { %v1274_v9 = vmax.f32 %v1178_v5, 0.0 }
 0x1d5   : > { %v1275_v12 = vmax.f32 %v1180_v7, 0.0 }
 0x1d6   : > { %v1316_v13 = vpack.c.bf16 %v1274_v9, %v1272_v8 }
 0x1d7   : > { %v1317_v15 = vpack.c.bf16 %v1275_v12, %v1273_v11  ;;  %v1183_v16 = vpop.f32.mrb[44].mxu0 }
 0x1d8   : > { %v1184_v17 = vadd.f32 %v1183_v16, %v853_v14  ;;  %v1185_v18 = vpop.f32.mrb[45].mxu0 }
 0x1d9   : > { %v1186_v20 = vadd.f32 %v1185_v18, %v853_v14  ;;  %v1187_v21 = vpop.f32.mrb[46].mxu0  ;;  %1732 = vmatprep.subr.bf16.mxu1 %v1317_v15  ;;  %v893_v14 = vpop.permute.xlu0 %892 }
 0x1da   : > { %v1188_v22 = vadd.f32 %v1187_v21, %v858_v19  ;;  %v1189_v23 = vpop.f32.mrb[47].mxu0  ;;  %1733 = vmatpush1.bf16.msra.mxu1 %v1316_v13  ;;  %v1276_v25 = vmax.f32 %v1184_v17, 0.0 }
 0x1db   : > { %v1190_v24 = vadd.f32 %v1189_v23, %v858_v19  ;;  %v1277_v27 = vmax.f32 %v1186_v20, 0.0  ;;  %v898_v19 = vpop.permute.xlu1 %897 }
 0x1dc   : > { %v1278_v26 = vmax.f32 %v1188_v22, 0.0 }
 0x1dd   : > { %v1279_v10 = vmax.f32 %v1190_v24, 0.0 }
 0x1de   : > { %v1318_v28 = vpack.c.bf16 %v1278_v26, %v1276_v25 }
 0x1df   : > { %v1319_v30 = vpack.c.bf16 %v1279_v10, %v1277_v27  ;;  %v1193_v31 = vpop.f32.mrb[48].mxu0 }
 0x1e0   : > { %v1194_v32 = vadd.f32 %v1193_v31, %v863_v29  ;;  %v1195_v33 = vpop.f32.mrb[49].mxu0  ;;  %v3172_v31 = vld [vmem:[%s4686_s3 + $0x14] ss:$8 sps:$4 sm:$0xff]  }
 0x1e1   : > { %v1196_v35 = vadd.f32 %v1195_v33, %v863_v29  ;;  %v1197_v36 = vpop.f32.mrb[50].mxu0  ;;  %1734 = vmatprep.subr.bf16.mxu1 %v1319_v30  ;;  %v3169_v30 = vld [vmem:[%s4686_s3] ss:$8 sps:$4 sm:$0xff]   ;;  %v3175_v33 = vld [vmem:[%s4686_s3 + $0x24] ss:$8 sps:$4 sm:$0xff]  }
 0x1e2   : > { %v1198_v37 = vadd.f32 %v1197_v36, %v868_v34  ;;  %v1199_v38 = vpop.f32.mrb[51].mxu0  ;;  %1735 = vmatpush1.bf16.msra.mxu1 %v1318_v28  ;;  %v1280_v40 = vmax.f32 %v1194_v32, 0.0  ;;  %v3174_v32 = vld [vmem:[%s4686_s3 + $0x10] ss:$8 sps:$4 sm:$0xff]  }
 0x1e3   : > { %v1200_v39 = vadd.f32 %v1199_v38, %v868_v34  ;;  %v1281_v42 = vmax.f32 %v1196_v35, 0.0  ;;  %v3177_v34 = vld [vmem:[%s4686_s3 + $0x20] ss:$8 sps:$4 sm:$0xff]   ;;  %v3178_v35 = vld [vmem:[%s4686_s3 + $0x34] ss:$8 sps:$4 sm:$0xff]  }
 0x1e4   : > { %v1282_v41 = vmax.f32 %v1198_v37, 0.0  ;;  %v3180_v36 = vld [vmem:[%s4686_s3 + $0x30] ss:$8 sps:$4 sm:$0xff]   ;;  %v3181_v37 = vld [vmem:[%s4686_s3 + $0x44] ss:$8 sps:$4 sm:$0xff]  }
 0x1e5   : > { %v1283_v43 = vmax.f32 %v1200_v39, 0.0  ;;  %v3183_v38 = vld [vmem:[%s4686_s3 + $0x40] ss:$8 sps:$4 sm:$0xff]   ;;  %v3184_v39 = vld [vmem:[%s4686_s3 + $0x54] ss:$8 sps:$4 sm:$0xff]  }
 0x1e6   : > { %v1320_v44 = vpack.c.bf16 %v1282_v41, %v1280_v40  ;;  %v3186_v40 = vld [vmem:[%s4686_s3 + $0x50] ss:$8 sps:$4 sm:$0xff]   ;;  %v3187_v41 = vld [vmem:[%s4686_s3 + $0x64] ss:$8 sps:$4 sm:$0xff]  }
 0x1e7   : > { %v1321_v46 = vpack.c.bf16 %v1283_v43, %v1281_v42  ;;  %v1203_v47 = vpop.f32.mrb[52].mxu0  ;;  %v3189_v42 = vld [vmem:[%s4686_s3 + $0x60] ss:$8 sps:$4 sm:$0xff]   ;;  %v3190_v43 = vld [vmem:[%s4686_s3 + $0x74] ss:$8 sps:$4 sm:$0xff]  }
 0x1e8   : > { %v1204_v48 = vadd.f32 %v1203_v47, %v873_v45  ;;  %v1205_v49 = vpop.f32.mrb[53].mxu0  ;;  %v3196_v47 = vld [vmem:[%s4686_s3 + $0x94] ss:$8 sps:$4 sm:$0xff]  }
 0x1e9   : > { %v1206_v51 = vadd.f32 %v1205_v49, %v873_v45  ;;  %v1207_v52 = vpop.f32.mrb[54].mxu0  ;;  %1736 = vmatprep.subr.bf16.mxu1 %v1321_v46  ;;  %v3193_v45 = vld [vmem:[%s4686_s3 + $0x84] ss:$8 sps:$4 sm:$0xff]   ;;  %v3195_v46 = vld [vmem:[%s4686_s3 + $0x80] ss:$8 sps:$4 sm:$0xff]  }
 0x1ea   : > { %v1208_v53 = vadd.f32 %v1207_v52, %v878_v50  ;;  %v1209_v54 = vpop.f32.mrb[55].mxu0  ;;  %1737 = vmatpush1.bf16.msra.mxu1 %v1320_v44  ;;  %v1284_v56 = vmax.f32 %v1204_v48, 0.0  ;;  %v3192_v44 = vld [vmem:[%s4686_s3 + $0x70] ss:$8 sps:$4 sm:$0xff]   ;;  %v3199_v49 = vld [vmem:[%s4686_s3 + $0xa4] ss:$8 sps:$4 sm:$0xff]  }
 0x1eb   : > { %v1210_v55 = vadd.f32 %v1209_v54, %v878_v50  ;;  %v1285_v58 = vmax.f32 %v1206_v51, 0.0  ;;  %v3198_v48 = vld [vmem:[%s4686_s3 + $0x90] ss:$8 sps:$4 sm:$0xff]   ;;  %v3201_v50 = vld [vmem:[%s4686_s3 + $0xa0] ss:$8 sps:$4 sm:$0xff]  }
 0x1ec   : > { %v1286_v57 = vmax.f32 %v1208_v53, 0.0  ;;  %v3202_v51 = vld [vmem:[%s4686_s3 + $0xb4] ss:$8 sps:$4 sm:$0xff]   ;;  %v3204_v52 = vld [vmem:[%s4686_s3 + $0xb0] ss:$8 sps:$4 sm:$0xff]  }
 0x1ed   : > { %v1287_v59 = vmax.f32 %v1210_v55, 0.0  ;;  %v3205_v53 = vld [vmem:[%s4686_s3 + $0xc4] ss:$8 sps:$4 sm:$0xff]   ;;  %v3207_v54 = vld [vmem:[%s4686_s3 + $0xc0] ss:$8 sps:$4 sm:$0xff]  }
 0x1ee   : > { %v1322_v60 = vpack.c.bf16 %v1286_v57, %v1284_v56  ;;  %v3208_v55 = vld [vmem:[%s4686_s3 + $0xd4] ss:$8 sps:$4 sm:$0xff]   ;;  %v3210_v56 = vld [vmem:[%s4686_s3 + $0xd0] ss:$8 sps:$4 sm:$0xff]   ;;  %v3211_v57 = vld [vmem:[%s4686_s3 + $0xe4] ss:$8 sps:$4 sm:$0xff]  }
 0x1ef   : > { %v1323_v62 = vpack.c.bf16 %v1287_v59, %v1285_v58  ;;  %v1213_v63 = vpop.f32.mrb[56].mxu0  ;;  %v3213_v58 = vld [vmem:[%s4686_s3 + $0xe0] ss:$8 sps:$4 sm:$0xff]   ;;  %v3214_v59 = vld [vmem:[%s4686_s3 + $0xf4] ss:$8 sps:$4 sm:$0xff]  }
 0x1f0   : > { %v1214_v0 = vadd.f32 %v1213_v63, %v883_v61  ;;  %v1215_v1 = vpop.f32.mrb[57].mxu0  ;;  %v2014_v63 = vlaneseq }
 0x1f1   : > { %v1216_v3 = vadd.f32 %v1215_v1, %v883_v61  ;;  %v1217_v4 = vpop.f32.mrb[58].mxu0  ;;  %1738 = vmatprep.subr.bf16.mxu1 %v1323_v62  ;;  %v3500_v61 = vmov 1966171168  }
 0x1f2   : > { %v1218_v5 = vadd.f32 %v1217_v4, %v888_v2  ;;  %v1219_v6 = vpop.f32.mrb[59].mxu0  ;;  %1739 = vmatpush1.bf16.msra.mxu1 %v1322_v60  ;;  %v1288_v8 = vmax.f32 %v1214_v0, 0.0  ;;  %v3216_v60 = vld [vmem:[%s4686_s3 + $0xf0] ss:$8 sps:$4 sm:$0xff]   ;;  %v2012_v62 = vunpack.c.l.s4 %v3500_v61  ;;  %v2015_v1 = vshrl.u32 %v2014_v63, 7 }
 0x1f3   : > { %v1220_v7 = vadd.f32 %v1219_v6, %v888_v2  ;;  %v1289_v11 = vmax.f32 %v1216_v3, 0.0  ;;  %v1395_v2 = vpop.permute.xlu0 %1394  ;;  %v4243_v4 = vld.sshfl [vmem:[%s4688_s5] sm:$0x11 pattern:$0x75316420]  ;;  %vm2088_vm1 = vcmp.lt.s32.totalorder %v2014_v63, 256 }
 0x1f4   : > { %v1290_v9 = vmax.f32 %v1218_v5, 0.0  ;;  %v2013_v0 = vunpack.c.0.s8 %v2012_v62 }
 0x1f5   : > { %v1291_v12 = vmax.f32 %v1220_v7, 0.0  ;;  %v2010_v7 = vcombine.high %v4243_v4, %v4243_v4 }
 0x1f6   : > { %v1324_v13 = vpack.c.bf16 %v1290_v9, %v1288_v8  ;;  %v4247_v8 = vsub.s32 %v2013_v0, %v2015_v1  ;;  %v1400_v9 = vpop.permute.xlu1 %1399 }
 0x1f7   : > { %v1325_v15 = vpack.c.bf16 %v1291_v12, %v1289_v11  ;;  %v1223_v16 = vpop.f32.mrb[60].mxu0 }
 0x1f8   : > { %v1224_v17 = vadd.f32 %v1223_v16, %v893_v14  ;;  %v1225_v18 = vpop.f32.mrb[61].mxu0 }
 0x1f9   : > { %v1226_v20 = vadd.f32 %v1225_v18, %v893_v14  ;;  %v1227_v21 = vpop.f32.mrb[62].mxu0  ;;  %1740 = vmatprep.subr.bf16.mxu1 %v1325_v15  ;;  %v2024_v15 = vrot.slane %v2010_v7, %v4247_v8 }
 0x1fa   : > { %v1228_v22 = vadd.f32 %v1227_v21, %v898_v19  ;;  %v1229_v23 = vpop.f32.mrb[63].mxu0  ;;  %1741 = vmatpush1.bf16.msra.mxu1 %v1324_v13  ;;  %v1292_v25 = vmax.f32 %v1224_v17, 0.0 }
 0x1fb   : > { %v1230_v24 = vadd.f32 %v1229_v23, %v898_v19  ;;  %v1293_v27 = vmax.f32 %v1226_v20, 0.0  ;;  %2059 = vmatprep.mubr.bf16.mxu0 %v2024_v15 }
 0x1fc   : > { %v1294_v26 = vmax.f32 %v1228_v22, 0.0  ;;  %v1405_v22 = vpop.permute.xlu0 %1404 }
 0x1fd   : > { %v1295_v10 = vmax.f32 %v1230_v24, 0.0 }
 0x1fe   : > { %v1326_v28 = vpack.c.bf16 %v1294_v26, %v1292_v25 }
 0x1ff   : > { %v1327_v29 = vpack.c.bf16 %v1295_v10, %v1293_v27  ;;  %v1410_v27 = vpop.permute.xlu1 %1409 }
 0x201   : > { %1742 = vmatprep.subr.bf16.mxu1 %v1327_v29 }
 0x202   : > { %1743 = vmatpush1.bf16.msra.mxu1 %v1326_v28 }
 0x205   : > { %1745 = vmatmul.mubr.bf16.vlgmr.msra.gmra.mrb[0].mxu1 %v3169_v30 }
 0x206   : > { %1754 = vmatprep.mubr.bf16.mxu1 %v3172_v31 }
 0x20d   : > { %1755 = vmatmul.mubr.bf16.gmra.mrb[4].mxu1 %v3174_v32 }
 0x20e   : > { %1764 = vmatprep.mubr.bf16.mxu1 %v3175_v33 }
 0x215   : > { %1765 = vmatmul.mubr.bf16.gmra.mrb[8].mxu1 %v3177_v34 }
 0x216   : > { %1774 = vmatprep.mubr.bf16.mxu1 %v3178_v35 }
 0x21d   : > { %1775 = vmatmul.mubr.bf16.gmra.mrb[12].mxu1 %v3180_v36 }
 0x21e   : > { %1784 = vmatprep.mubr.bf16.mxu1 %v3181_v37  ;;  %v1415_v37 = vpop.permute.xlu0 %1414 }
 0x225   : > { %1785 = vmatmul.mubr.bf16.gmra.mrb[16].mxu1 %v3183_v38 }
 0x226   : > { %1794 = vmatprep.mubr.bf16.mxu1 %v3184_v39 }
 0x22d   : > { %1795 = vmatmul.mubr.bf16.gmra.mrb[20].mxu1 %v3186_v40 }
 0x22e   : > { %1804 = vmatprep.mubr.bf16.mxu1 %v3187_v41 }
 0x235   : > { %1805 = vmatmul.mubr.bf16.gmra.mrb[24].mxu1 %v3189_v42  ;;  %v1420_v42 = vpop.permute.xlu1 %1419 }
 0x236   : > { %1814 = vmatprep.mubr.bf16.mxu1 %v3190_v43 }
 0x23d   : > { %1815 = vmatmul.mubr.bf16.gmra.mrb[28].mxu1 %v3192_v44 }
 0x23e   : > { %1824 = vmatprep.mubr.bf16.mxu1 %v3193_v45 }
 0x245   : > { %1825 = vmatmul.mubr.bf16.gmra.mrb[32].mxu1 %v3195_v46 }
 0x246   : > { %1834 = vmatprep.mubr.bf16.mxu1 %v3196_v47 }
 0x24d   : > { %1835 = vmatmul.mubr.bf16.gmra.mrb[36].mxu1 %v3198_v48 }
 0x24e   : > { %1844 = vmatprep.mubr.bf16.mxu1 %v3199_v49 }
 0x255   : > { %1845 = vmatmul.mubr.bf16.gmra.mrb[40].mxu1 %v3201_v50 }
 0x256   : > { %1854 = vmatprep.mubr.bf16.mxu1 %v3202_v51 }
 0x25d   : > { %1855 = vmatmul.mubr.bf16.gmra.mrb[44].mxu1 %v3204_v52 }
 0x25e   : > { %1864 = vmatprep.mubr.bf16.mxu1 %v3205_v53  ;;  %v1425_v53 = vpop.permute.xlu0 %1424 }
 0x262   : > { %v1435_v7 = vpop.permute.xlu0 %1434 }
 0x265   : > { %1865 = vmatmul.mubr.bf16.gmra.mrb[48].mxu1 %v3207_v54 }
 0x266   : > { %1874 = vmatprep.mubr.bf16.mxu1 %v3208_v55 }
 0x26d   : > { %1875 = vmatmul.mubr.bf16.gmra.mrb[52].mxu1 %v3210_v56 }
 0x26e   : > { %1884 = vmatprep.mubr.bf16.mxu1 %v3211_v57 }
 0x275   : > { %1885 = vmatmul.mubr.bf16.gmra.mrb[56].mxu1 %v3213_v58  ;;  %v1430_v58 = vpop.permute.xlu1 %1429 }
 0x276   : > { %1894 = vmatprep.mubr.bf16.mxu1 %v3214_v59 }
 0x27d   : > { %1895 = vmatmul.mubr.bf16.gmra.mrb[60].mxu1 %v3216_v60 }
 0x2d8   : > { %v1746_v3 = vpop.f32.mrb[0].mxu1 }
 0x2d9   : > { %v1747_v5 = vadd.f32 %v1746_v3, %v1395_v2  ;;  %v1748_v6 = vpop.f32.mrb[1].mxu1 }
 0x2da   : > { %v1749_v11 = vadd.f32 %v1748_v6, %v1395_v2  ;;  %v1750_v12 = vpop.f32.mrb[2].mxu1 }
 0x2db   : > { %v1751_v13 = vadd.f32 %v1750_v12, %v1400_v9  ;;  %v1752_v14 = vpop.f32.mrb[3].mxu1  ;;  %v1905_v17 = vmax.f32 %v1747_v5, 0.0 }
 0x2dc   : > { %v1753_v16 = vadd.f32 %v1752_v14, %v1400_v9  ;;  %v1906_v19 = vmax.f32 %v1749_v11, 0.0  ;;  %v1440_v14 = vpop.permute.xlu1 %1439 }
 0x2dd   : > { %v1907_v18 = vmax.f32 %v1751_v13, 0.0 }
 0x2de   : > { %v1908_v20 = vmax.f32 %v1753_v16, 0.0 }
 0x2df   : > { %v1969_v21 = vpack.c.bf16 %v1907_v18, %v1905_v17 }
 0x2e0   : > { %v1970_v23 = vpack.c.bf16 %v1908_v20, %v1906_v19  ;;  %v1756_v24 = vpop.f32.mrb[4].mxu1 }
 0x2e1   : > { %v1757_v25 = vadd.f32 %v1756_v24, %v1405_v22  ;;  %v1758_v26 = vpop.f32.mrb[5].mxu1 }
 0x2e2   : > { %v1759_v10 = vadd.f32 %v1758_v26, %v1405_v22  ;;  %v1760_v28 = vpop.f32.mrb[6].mxu1  ;;  %2027 = vmatprep.subr.bf16.mxu0 %v1970_v23 }
 0x2e3   : > { %v1761_v29 = vadd.f32 %v1760_v28, %v1410_v27  ;;  %v1762_v30 = vpop.f32.mrb[7].mxu1  ;;  %2028 = vmatpush1.bf16.msra.mxu0 %v1969_v21  ;;  %v1909_v32 = vmax.f32 %v1757_v25, 0.0  ;;  %v1445_v25 = vpop.permute.xlu0 %1444 }
 0x2e4   : > { %v1763_v31 = vadd.f32 %v1762_v30, %v1410_v27  ;;  %v1910_v34 = vmax.f32 %v1759_v10, 0.0 }
 0x2e5   : > { %v1911_v33 = vmax.f32 %v1761_v29, 0.0  ;;  %v1450_v29 = vpop.permute.xlu1 %1449 }
 0x2e6   : > { %v1912_v35 = vmax.f32 %v1763_v31, 0.0 }
 0x2e7   : > { %v1971_v36 = vpack.c.bf16 %v1911_v33, %v1909_v32 }
 0x2e8   : > { %v1972_v38 = vpack.c.bf16 %v1912_v35, %v1910_v34  ;;  %v1766_v39 = vpop.f32.mrb[8].mxu1 }
 0x2e9   : > { %v1767_v40 = vadd.f32 %v1766_v39, %v1415_v37  ;;  %v1768_v41 = vpop.f32.mrb[9].mxu1 }
 0x2ea   : > { %v1769_v43 = vadd.f32 %v1768_v41, %v1415_v37  ;;  %v1770_v44 = vpop.f32.mrb[10].mxu1  ;;  %2029 = vmatprep.subr.bf16.mxu0 %v1972_v38 }
 0x2eb   : > { %v1771_v45 = vadd.f32 %v1770_v44, %v1420_v42  ;;  %v1772_v46 = vpop.f32.mrb[11].mxu1  ;;  %2030 = vmatpush1.bf16.msra.mxu0 %v1971_v36  ;;  %v1913_v48 = vmax.f32 %v1767_v40, 0.0  ;;  %v1455_v40 = vpop.permute.xlu0 %1454 }
 0x2ec   : > { %v1773_v47 = vadd.f32 %v1772_v46, %v1420_v42  ;;  %v1914_v50 = vmax.f32 %v1769_v43, 0.0 }
 0x2ed   : > { %v1915_v49 = vmax.f32 %v1771_v45, 0.0  ;;  %v1460_v45 = vpop.permute.xlu1 %1459 }
 0x2ee   : > { %v1916_v51 = vmax.f32 %v1773_v47, 0.0 }
 0x2ef   : > { %v1973_v52 = vpack.c.bf16 %v1915_v49, %v1913_v48 }
 0x2f0   : > { %v1974_v54 = vpack.c.bf16 %v1916_v51, %v1914_v50  ;;  %v1776_v55 = vpop.f32.mrb[12].mxu1 }
 0x2f1   : > { %v1777_v56 = vadd.f32 %v1776_v55, %v1425_v53  ;;  %v1778_v57 = vpop.f32.mrb[13].mxu1 }
 0x2f2   : > { %v1779_v59 = vadd.f32 %v1778_v57, %v1425_v53  ;;  %v1780_v60 = vpop.f32.mrb[14].mxu1  ;;  %2031 = vmatprep.subr.bf16.mxu0 %v1974_v54 }
 0x2f3   : > { %v1781_v61 = vadd.f32 %v1780_v60, %v1430_v58  ;;  %v1782_v62 = vpop.f32.mrb[15].mxu1  ;;  %2032 = vmatpush1.bf16.msra.mxu0 %v1973_v52  ;;  %v1917_v1 = vmax.f32 %v1777_v56, 0.0  ;;  %v1465_v56 = vpop.permute.xlu0 %1464 }
 0x2f4   : > { %v1783_v0 = vadd.f32 %v1782_v62, %v1430_v58  ;;  %v1918_v3 = vmax.f32 %v1779_v59, 0.0 }
 0x2f5   : > { %v1919_v2 = vmax.f32 %v1781_v61, 0.0  ;;  %v1470_v61 = vpop.permute.xlu1 %1469 }
 0x2f6   : > { %v1920_v5 = vmax.f32 %v1783_v0, 0.0 }
 0x2f7   : > { %v1975_v6 = vpack.c.bf16 %v1919_v2, %v1917_v1 }
 0x2f8   : > { %v1976_v9 = vpack.c.bf16 %v1920_v5, %v1918_v3  ;;  %v1786_v11 = vpop.f32.mrb[16].mxu1 }
 0x2f9   : > { %v1787_v12 = vadd.f32 %v1786_v11, %v1435_v7  ;;  %v1788_v13 = vpop.f32.mrb[17].mxu1 }
 0x2fa   : > { %v1789_v15 = vadd.f32 %v1788_v13, %v1435_v7  ;;  %v1790_v16 = vpop.f32.mrb[18].mxu1  ;;  %2033 = vmatprep.subr.bf16.mxu0 %v1976_v9 }
 0x2fb   : > { %v1791_v17 = vadd.f32 %v1790_v16, %v1440_v14  ;;  %v1792_v18 = vpop.f32.mrb[19].mxu1  ;;  %2034 = vmatpush1.bf16.msra.mxu0 %v1975_v6  ;;  %v1921_v20 = vmax.f32 %v1787_v12, 0.0  ;;  %v1475_v12 = vpop.permute.xlu0 %1474 }
 0x2fc   : > { %v1793_v19 = vadd.f32 %v1792_v18, %v1440_v14  ;;  %v1922_v22 = vmax.f32 %v1789_v15, 0.0 }
 0x2fd   : > { %v1923_v21 = vmax.f32 %v1791_v17, 0.0  ;;  %v1480_v17 = vpop.permute.xlu1 %1479 }
 0x2fe   : > { %v1924_v23 = vmax.f32 %v1793_v19, 0.0 }
 0x2ff   : > { %v1977_v24 = vpack.c.bf16 %v1923_v21, %v1921_v20 }
 0x300   : > { %v1978_v26 = vpack.c.bf16 %v1924_v23, %v1922_v22  ;;  %v1796_v27 = vpop.f32.mrb[20].mxu1 }
 0x301   : > { %v1797_v10 = vadd.f32 %v1796_v27, %v1445_v25  ;;  %v1798_v28 = vpop.f32.mrb[21].mxu1 }
 0x302   : > { %v1799_v30 = vadd.f32 %v1798_v28, %v1445_v25  ;;  %v1800_v31 = vpop.f32.mrb[22].mxu1  ;;  %2035 = vmatprep.subr.bf16.mxu0 %v1978_v26 }
 0x303   : > { %v1801_v32 = vadd.f32 %v1800_v31, %v1450_v29  ;;  %v1802_v33 = vpop.f32.mrb[23].mxu1  ;;  %2036 = vmatpush1.bf16.msra.mxu0 %v1977_v24  ;;  %v1925_v35 = vmax.f32 %v1797_v10, 0.0  ;;  %v1485_v10 = vpop.permute.xlu0 %1484 }
 0x304   : > { %v1803_v34 = vadd.f32 %v1802_v33, %v1450_v29  ;;  %v1926_v37 = vmax.f32 %v1799_v30, 0.0 }
 0x305   : > { %v1927_v36 = vmax.f32 %v1801_v32, 0.0  ;;  %v1490_v32 = vpop.permute.xlu1 %1489 }
 0x306   : > { %v1928_v38 = vmax.f32 %v1803_v34, 0.0 }
 0x307   : > { %v1979_v39 = vpack.c.bf16 %v1927_v36, %v1925_v35 }
 0x308   : > { %v1980_v41 = vpack.c.bf16 %v1928_v38, %v1926_v37  ;;  %v1806_v42 = vpop.f32.mrb[24].mxu1 }
 0x309   : > { %v1807_v43 = vadd.f32 %v1806_v42, %v1455_v40  ;;  %v1808_v44 = vpop.f32.mrb[25].mxu1 }
 0x30a   : > { %v1809_v46 = vadd.f32 %v1808_v44, %v1455_v40  ;;  %v1810_v47 = vpop.f32.mrb[26].mxu1  ;;  %2037 = vmatprep.subr.bf16.mxu0 %v1980_v41 }
 0x30b   : > { %v1811_v48 = vadd.f32 %v1810_v47, %v1460_v45  ;;  %v1812_v49 = vpop.f32.mrb[27].mxu1  ;;  %2038 = vmatpush1.bf16.msra.mxu0 %v1979_v39  ;;  %v1929_v51 = vmax.f32 %v1807_v43, 0.0  ;;  %v1495_v43 = vpop.permute.xlu0 %1494 }
 0x30c   : > { %v1813_v50 = vadd.f32 %v1812_v49, %v1460_v45  ;;  %v1930_v53 = vmax.f32 %v1809_v46, 0.0 }
 0x30d   : > { %v1931_v52 = vmax.f32 %v1811_v48, 0.0  ;;  %v1500_v48 = vpop.permute.xlu1 %1499 }
 0x30e   : > { %v1932_v54 = vmax.f32 %v1813_v50, 0.0 }
 0x30f   : > { %v1981_v55 = vpack.c.bf16 %v1931_v52, %v1929_v51 }
 0x310   : > { %v1982_v57 = vpack.c.bf16 %v1932_v54, %v1930_v53  ;;  %v1816_v58 = vpop.f32.mrb[28].mxu1 }
 0x311   : > { %v1817_v59 = vadd.f32 %v1816_v58, %v1465_v56  ;;  %v1818_v60 = vpop.f32.mrb[29].mxu1 }
 0x312   : > { %v1819_v62 = vadd.f32 %v1818_v60, %v1465_v56  ;;  %v1820_v0 = vpop.f32.mrb[30].mxu1  ;;  %2039 = vmatprep.subr.bf16.mxu0 %v1982_v57 }
 0x313   : > { %v1821_v1 = vadd.f32 %v1820_v0, %v1470_v61  ;;  %v1822_v2 = vpop.f32.mrb[31].mxu1  ;;  %2040 = vmatpush1.bf16.msra.mxu0 %v1981_v55  ;;  %v1933_v5 = vmax.f32 %v1817_v59, 0.0  ;;  %v1505_v59 = vpop.permute.xlu0 %1504 }
 0x314   : > { %v1823_v3 = vadd.f32 %v1822_v2, %v1470_v61  ;;  %v1934_v7 = vmax.f32 %v1819_v62, 0.0 }
 0x315   : > { %v1935_v6 = vmax.f32 %v1821_v1, 0.0  ;;  %v1510_v1 = vpop.permute.xlu1 %1509 }
 0x316   : > { %v1936_v9 = vmax.f32 %v1823_v3, 0.0 }
 0x317   : > { %v1983_v11 = vpack.c.bf16 %v1935_v6, %v1933_v5 }
 0x318   : > { %v1984_v13 = vpack.c.bf16 %v1936_v9, %v1934_v7  ;;  %v1826_v14 = vpop.f32.mrb[32].mxu1 }
 0x319   : > { %v1827_v15 = vadd.f32 %v1826_v14, %v1475_v12  ;;  %v1828_v16 = vpop.f32.mrb[33].mxu1 }
 0x31a   : > { %v1829_v18 = vadd.f32 %v1828_v16, %v1475_v12  ;;  %v1830_v19 = vpop.f32.mrb[34].mxu1  ;;  %2041 = vmatprep.subr.bf16.mxu0 %v1984_v13 }
 0x31b   : > { %v1831_v20 = vadd.f32 %v1830_v19, %v1480_v17  ;;  %v1832_v21 = vpop.f32.mrb[35].mxu1  ;;  %2042 = vmatpush1.bf16.msra.mxu0 %v1983_v11  ;;  %v1937_v23 = vmax.f32 %v1827_v15, 0.0  ;;  %v1515_v15 = vpop.permute.xlu0 %1514 }
 0x31c   : > { %v1833_v22 = vadd.f32 %v1832_v21, %v1480_v17  ;;  %v1938_v25 = vmax.f32 %v1829_v18, 0.0 }
 0x31d   : > { %v1939_v24 = vmax.f32 %v1831_v20, 0.0  ;;  %v1520_v20 = vpop.permute.xlu1 %1519 }
 0x31e   : > { %v1940_v26 = vmax.f32 %v1833_v22, 0.0 }
 0x31f   : > { %v1985_v27 = vpack.c.bf16 %v1939_v24, %v1937_v23 }
 0x320   : > { %v1986_v28 = vpack.c.bf16 %v1940_v26, %v1938_v25  ;;  %v1836_v29 = vpop.f32.mrb[36].mxu1 }
 0x321   : > { %v1837_v30 = vadd.f32 %v1836_v29, %v1485_v10  ;;  %v1838_v31 = vpop.f32.mrb[37].mxu1 }
 0x322   : > { %v1839_v33 = vadd.f32 %v1838_v31, %v1485_v10  ;;  %v1840_v34 = vpop.f32.mrb[38].mxu1  ;;  %2043 = vmatprep.subr.bf16.mxu0 %v1986_v28 }
 0x323   : > { %v1841_v35 = vadd.f32 %v1840_v34, %v1490_v32  ;;  %v1842_v36 = vpop.f32.mrb[39].mxu1  ;;  %2044 = vmatpush1.bf16.msra.mxu0 %v1985_v27  ;;  %v1941_v38 = vmax.f32 %v1837_v30, 0.0  ;;  %v1525_v30 = vpop.permute.xlu0 %1524 }
 0x324   : > { %v1843_v37 = vadd.f32 %v1842_v36, %v1490_v32  ;;  %v1942_v40 = vmax.f32 %v1839_v33, 0.0 }
 0x325   : > { %v1943_v39 = vmax.f32 %v1841_v35, 0.0  ;;  %v1530_v35 = vpop.permute.xlu1 %1529 }
 0x326   : > { %v1944_v41 = vmax.f32 %v1843_v37, 0.0 }
 0x327   : > { %v1987_v42 = vpack.c.bf16 %v1943_v39, %v1941_v38 }
 0x328   : > { %v1988_v44 = vpack.c.bf16 %v1944_v41, %v1942_v40  ;;  %v1846_v45 = vpop.f32.mrb[40].mxu1 }
 0x329   : > { %v1847_v46 = vadd.f32 %v1846_v45, %v1495_v43  ;;  %v1848_v47 = vpop.f32.mrb[41].mxu1 }
 0x32a   : > { %v1849_v49 = vadd.f32 %v1848_v47, %v1495_v43  ;;  %v1850_v50 = vpop.f32.mrb[42].mxu1  ;;  %2045 = vmatprep.subr.bf16.mxu0 %v1988_v44 }
 0x32b   : > { %v1851_v51 = vadd.f32 %v1850_v50, %v1500_v48  ;;  %v1852_v52 = vpop.f32.mrb[43].mxu1  ;;  %2046 = vmatpush1.bf16.msra.mxu0 %v1987_v42  ;;  %v1945_v54 = vmax.f32 %v1847_v46, 0.0  ;;  %v1535_v46 = vpop.permute.xlu0 %1534 }
 0x32c   : > { %v1853_v53 = vadd.f32 %v1852_v52, %v1500_v48  ;;  %v1946_v56 = vmax.f32 %v1849_v49, 0.0 }
 0x32d   : > { %v1947_v55 = vmax.f32 %v1851_v51, 0.0  ;;  %v1540_v51 = vpop.permute.xlu1 %1539 }
 0x32e   : > { %v1948_v57 = vmax.f32 %v1853_v53, 0.0 }
 0x32f   : > { %v1989_v58 = vpack.c.bf16 %v1947_v55, %v1945_v54 }
 0x330   : > { %v1990_v60 = vpack.c.bf16 %v1948_v57, %v1946_v56  ;;  %v1856_v61 = vpop.f32.mrb[44].mxu1 }
 0x331   : > { %v1857_v62 = vadd.f32 %v1856_v61, %v1505_v59  ;;  %v1858_v0 = vpop.f32.mrb[45].mxu1 }
 0x332   : > { %v1859_v2 = vadd.f32 %v1858_v0, %v1505_v59  ;;  %v1860_v3 = vpop.f32.mrb[46].mxu1  ;;  %2047 = vmatprep.subr.bf16.mxu0 %v1990_v60 }
 0x333   : > { %v1861_v5 = vadd.f32 %v1860_v3, %v1510_v1  ;;  %v1862_v6 = vpop.f32.mrb[47].mxu1  ;;  %2048 = vmatpush1.bf16.msra.mxu0 %v1989_v58  ;;  %v1949_v9 = vmax.f32 %v1857_v62, 0.0  ;;  %v1545_v62 = vpop.permute.xlu0 %1544 }
 0x334   : > { %v1863_v7 = vadd.f32 %v1862_v6, %v1510_v1  ;;  %v1950_v12 = vmax.f32 %v1859_v2, 0.0 }
 0x335   : > { %v1951_v11 = vmax.f32 %v1861_v5, 0.0  ;;  %v1550_v5 = vpop.permute.xlu1 %1549 }
 0x336   : > { %v1952_v13 = vmax.f32 %v1863_v7, 0.0 }
 0x337   : > { %v1991_v14 = vpack.c.bf16 %v1951_v11, %v1949_v9 }
 0x338   : > { %v1992_v16 = vpack.c.bf16 %v1952_v13, %v1950_v12  ;;  %v1866_v17 = vpop.f32.mrb[48].mxu1 }
 0x339   : > { %v1867_v18 = vadd.f32 %v1866_v17, %v1515_v15  ;;  %v1868_v19 = vpop.f32.mrb[49].mxu1 }
 0x33a   : > { %v1869_v21 = vadd.f32 %v1868_v19, %v1515_v15  ;;  %v1870_v22 = vpop.f32.mrb[50].mxu1  ;;  %2049 = vmatprep.subr.bf16.mxu0 %v1992_v16  ;;  %v2017_v19 = vrot.slane %v4243_v4, %v4247_v8 }
 0x33b   : > { %v1871_v23 = vadd.f32 %v1870_v22, %v1520_v20  ;;  %v1872_v24 = vpop.f32.mrb[51].mxu1  ;;  %2050 = vmatpush1.bf16.msra.mxu0 %v1991_v14  ;;  %v1953_v26 = vmax.f32 %v1867_v18, 0.0 }
 0x33c   : > { %v1873_v25 = vadd.f32 %v1872_v24, %v1520_v20  ;;  %v1954_v10 = vmax.f32 %v1869_v21, 0.0 }
 0x33d   : > { %v1955_v27 = vmax.f32 %v1871_v23, 0.0 }
 0x33e   : > { %v1956_v28 = vmax.f32 %v1873_v25, 0.0 }
 0x33f   : > { %v1993_v29 = vpack.c.bf16 %v1955_v27, %v1953_v26 }
 0x340   : > { %v1994_v31 = vpack.c.bf16 %v1956_v28, %v1954_v10  ;;  %v1876_v32 = vpop.f32.mrb[52].mxu1 }
 0x341   : > { %v1877_v33 = vadd.f32 %v1876_v32, %v1525_v30  ;;  %v1878_v34 = vpop.f32.mrb[53].mxu1 }
 0x342   : > { %v1879_v36 = vadd.f32 %v1878_v34, %v1525_v30  ;;  %v1880_v37 = vpop.f32.mrb[54].mxu1  ;;  %2051 = vmatprep.subr.bf16.mxu0 %v1994_v31 }
 0x343   : > { %v1881_v38 = vadd.f32 %v1880_v37, %v1530_v35  ;;  %v1882_v39 = vpop.f32.mrb[55].mxu1  ;;  %2052 = vmatpush1.bf16.msra.mxu0 %v1993_v29  ;;  %v1957_v41 = vmax.f32 %v1877_v33, 0.0 }
 0x344   : > { %v1883_v40 = vadd.f32 %v1882_v39, %v1530_v35  ;;  %v1958_v43 = vmax.f32 %v1879_v36, 0.0 }
 0x345   : > { %v1959_v42 = vmax.f32 %v1881_v38, 0.0 }
 0x346   : > { %v1960_v44 = vmax.f32 %v1883_v40, 0.0 }
 0x347   : > { %v1995_v45 = vpack.c.bf16 %v1959_v42, %v1957_v41 }
 0x348   : > { %v1996_v47 = vpack.c.bf16 %v1960_v44, %v1958_v43  ;;  %v1886_v48 = vpop.f32.mrb[56].mxu1 }
 0x349   : > { %v1887_v49 = vadd.f32 %v1886_v48, %v1535_v46  ;;  %v1888_v50 = vpop.f32.mrb[57].mxu1 }
 0x34a   : > { %v1889_v52 = vadd.f32 %v1888_v50, %v1535_v46  ;;  %v1890_v53 = vpop.f32.mrb[58].mxu1  ;;  %2053 = vmatprep.subr.bf16.mxu0 %v1996_v47 }
 0x34b   : > { %v1891_v54 = vadd.f32 %v1890_v53, %v1540_v51  ;;  %v1892_v55 = vpop.f32.mrb[59].mxu1  ;;  %2054 = vmatpush1.bf16.msra.mxu0 %v1995_v45  ;;  %v1961_v57 = vmax.f32 %v1887_v49, 0.0 }
 0x34c   : > { %v1893_v56 = vadd.f32 %v1892_v55, %v1540_v51  ;;  %v1962_v59 = vmax.f32 %v1889_v52, 0.0 }
 0x34d   : > { %v1963_v58 = vmax.f32 %v1891_v54, 0.0 }
 0x34e   : > { %v1964_v60 = vmax.f32 %v1893_v56, 0.0 }
 0x34f   : > { %v1997_v61 = vpack.c.bf16 %v1963_v58, %v1961_v57 }
 0x350   : > { %v1998_v0 = vpack.c.bf16 %v1964_v60, %v1962_v59  ;;  %v1896_v1 = vpop.f32.mrb[60].mxu1 }
 0x351   : > { %v1897_v2 = vadd.f32 %v1896_v1, %v1545_v62  ;;  %v1898_v3 = vpop.f32.mrb[61].mxu1 }
 0x352   : > { %v1899_v6 = vadd.f32 %v1898_v3, %v1545_v62  ;;  %v1900_v7 = vpop.f32.mrb[62].mxu1  ;;  %2055 = vmatprep.subr.bf16.mxu0 %v1998_v0 }
 0x353   : > { %v1901_v9 = vadd.f32 %v1900_v7, %v1550_v5  ;;  %v1902_v11 = vpop.f32.mrb[63].mxu1  ;;  %2056 = vmatpush1.bf16.msra.mxu0 %v1997_v61  ;;  %v1965_v13 = vmax.f32 %v1897_v2, 0.0 }
 0x354   : > { %v1903_v12 = vadd.f32 %v1902_v11, %v1550_v5  ;;  %v1966_v15 = vmax.f32 %v1899_v6, 0.0 }
 0x355   : > { %v1967_v14 = vmax.f32 %v1901_v9, 0.0 }
 0x356   : > { %v1968_v16 = vmax.f32 %v1903_v12, 0.0 }
 0x357   : > { %v1999_v17 = vpack.c.bf16 %v1967_v14, %v1965_v13 }
 0x358   : > { %v2000_v18 = vpack.c.bf16 %v1968_v16, %v1966_v15 }
 0x35a   : > { %2057 = vmatprep.subr.bf16.mxu0 %v2000_v18 }
 0x35b   : > { %2058 = vmatpush1.bf16.msra.mxu0 %v1999_v17 }
 0x35e   : > { %2060 = vmatmul.mubr.bf16.vlgmr.msra.gmra.mrb[64].mxu0 %v2017_v19 }
 0x431   : > { %v2061_v20 = vpop.f32.mrb[64].mxu0 }
 0x432   : > { %v2063_v21 = vpop.f32.mrb[65].mxu0 }
 0x433   : > { %v2070_v22 = vcombine.low %v2061_v20, %v2063_v21  ;;  %v2065_v23 = vpop.f32.mrb[66].mxu0  ;;  %2097 = sbr.rel (!%p3568_p5) target bundleno = 1247 (0x4df), region = 114 }
 0x434   : > { %v2066_v24 = vpop.f32.mrb[67].mxu0 }
 0x435   : > { %v2077_v25 = vrot.slane %v2070_v22, %v4247_v8 }
 0x437   : > { %v2084_v26 = vrot.slane %v2077_v25, %v4247_v8 }
 0x439   : > { %2090 = vst.msk [vmem:[%s4257_s24] sm:$0x3] %vm2088_vm1, %v2084_v26 }
 0x43a   : > { %s4729_s17 = smov (!%p2100_p1, %s2099_s17), 2 }
 0x43b   : > { %s2828_s12 = sshll.u32 %s4729_s17, 4 }
 0x43c   : > { %p2830_p2 = scmp.eq.s32.totalorder %s2828_s12, 0 }
 0x43d   : > { %p2108_p3 = scmp.lt.u32.totalorder (!%p2830_p2), %s4729_s17, 8 }
 0x43e   : > { %2107 = sbr.rel (%p2830_p2) target bundleno = 1247 (0x4df), region = 118 }
 0x445   : > { %2111 = sbr.rel (%p2108_p3) target bundleno = 1238 (0x4d6), region = 122  ;;  %s4274_s29 = sand.u32 (!%p2108_p3), 7, %s4729_s17  }
 0x446   : > { %p2127_p5 = scmp.eq.s32.totalorder (!%p2108_p3), %s4274_s29, 0  ;;  %p2831_p4 = scmp.ne.s32.totalorder (!%p2108_p3), %s4274_s29, 0 }
 0x44c   : > { %2130 = sbr.rel (%p2831_p4) target bundleno = 1167 (0x48f), region = 137  ;;  %s2131_s23 = sshrl.u32 (!%p2831_p4), %s4729_s17, 3 }
 0x44d   : > { %s4281_s13 = sshrl.u32 (!%p2831_p4), %s2131_s23, 6 }
 0x44e   : > { %p2832_p6 = scmp.le.s32.totalorder (!%p2831_p4), %s4281_s13, 0 }
 0x453   : > { %2654 = sbr.rel (%p2832_p6) target bundleno = 1147 (0x47b), region = 285  ;;  %s4705_s15 = smov (!%p2832_p6), %s4267_s0 }
 0x454   : > { %s4706_s16 = smov (!%p2832_p6), %s4257_s24  ;;  %s4290_s14 = smov (!%p2832_p6), 0  }
 0x455   : > { %s4292_s26 = smov (!%p2832_p6), 0  }
 0x45a LB: >> { %v2144_v63 = vld [vmem:[%s3439_s16] sm:$0xff]  ;;  %v2146_v4 = vld [vmem:[%s3439_s16 + $0x8] sm:$0xff]  ;;  %v2148_v8 = vld [vmem:[%s3439_s16 + $0x10] sm:$0xff]  ;;  %s2272_s20 = sadd.s32 1, %s3443_s14  ;;  %s2138_s26 = sadd.s32 1, %s3447_s26   ;;  %s3447_s26 = sphi %s4292_s26, %s2138_s26   ;;  %s3443_s14 = sphi %s4290_s14, %s4709_s14   ;;  %s3439_s16 = sphi %s4706_s16, %s4708_s16   ;;  %s3435_s15 = sphi %s4705_s15, %s4707_s15  }
 0x45b   : >> { %2145 = vst [vmem:[%s3435_s15] sm:$0xff] %v2144_v63  ;;  %2147 = vst [vmem:[%s3435_s15 + $0x8] sm:$0xff] %v2146_v4  ;;  %v2150_v27 = vld [vmem:[%s3439_s16 + $0x18] sm:$0xff]  ;;  %v2152_v10 = vld [vmem:[%s3439_s16 + $0x20] sm:$0xff]  ;;  %p2273_p7 = scmp.ge.s32.totalorder %s2272_s20, %s4281_s13  ;;  %p2137_p8 = scmp.ge.s32.totalorder %s2138_s26, %s4281_s13 }
 0x45c   : >> { %2149 = vst [vmem:[%s3435_s15 + $0x10] sm:$0xff] %v2148_v8  ;;  %v2154_v28 = vld [vmem:[%s3439_s16 + $0x28] sm:$0xff]  ;;  %2151 = vst [vmem:[%s3435_s15 + $0x18] sm:$0xff] %v2150_v27  ;;  %v2156_v29 = vld [vmem:[%s3439_s16 + $0x30] sm:$0xff] }
 0x45d   : >> { %2153 = vst [vmem:[%s3435_s15 + $0x20] sm:$0xff] %v2152_v10  ;;  %2155 = vst [vmem:[%s3435_s15 + $0x28] sm:$0xff] %v2154_v28  ;;  %v2158_v30 = vld [vmem:[%s3439_s16 + $0x38] sm:$0xff]  ;;  %v2160_v31 = vld [vmem:[%s3439_s16 + $0x40] sm:$0xff]  ;;  %s4731_s20 = smov (%p2273_p7, %s2272_s20), 0 }
 0x45e   : >> { %2157 = vst [vmem:[%s3435_s15 + $0x30] sm:$0xff] %v2156_v29  ;;  %2159 = vst [vmem:[%s3435_s15 + $0x38] sm:$0xff] %v2158_v30  ;;  %v2162_v32 = vld [vmem:[%s3439_s16 + $0x48] sm:$0xff]  ;;  %v2164_v33 = vld [vmem:[%s3439_s16 + $0x50] sm:$0xff]  ;;  %s2833_s19 = sshll.u32 %s4731_s20, 9  ;;  %s4709_s14 = smov %s4731_s20 }
 0x45f   : >> { %2161 = vst [vmem:[%s3435_s15 + $0x40] sm:$0xff] %v2160_v31  ;;  %v2166_v34 = vld [vmem:[%s3439_s16 + $0x58] sm:$0xff]  ;;  %2163 = vst [vmem:[%s3435_s15 + $0x48] sm:$0xff] %v2162_v32  ;;  %v2168_v35 = vld [vmem:[%s3439_s16 + $0x60] sm:$0xff]  ;;  %s4348_s9 = scalar_lea.vmem %s4257_s24, %s2833_s19 [#allocation3]   ;;  %s4351_s30 = scalar_lea.vmem %s4267_s0, %s2833_s19  }
 0x460   : >> { %2165 = vst [vmem:[%s3435_s15 + $0x50] sm:$0xff] %v2164_v33  ;;  %2167 = vst [vmem:[%s3435_s15 + $0x58] sm:$0xff] %v2166_v34  ;;  %v2170_v36 = vld [vmem:[%s3439_s16 + $0x68] sm:$0xff]  ;;  %v2172_v37 = vld [vmem:[%s3439_s16 + $0x70] sm:$0xff] }
 0x461   : >> { %2169 = vst [vmem:[%s3435_s15 + $0x60] sm:$0xff] %v2168_v35  ;;  %2171 = vst [vmem:[%s3435_s15 + $0x68] sm:$0xff] %v2170_v36  ;;  %v2174_v38 = vld [vmem:[%s3439_s16 + $0x78] sm:$0xff]  ;;  %v2176_v39 = vld [vmem:[%s3439_s16 + $0x80] sm:$0xff] }
 0x462   : >> { %2173 = vst [vmem:[%s3435_s15 + $0x70] sm:$0xff] %v2172_v37  ;;  %v2178_v40 = vld [vmem:[%s3439_s16 + $0x88] sm:$0xff]  ;;  %2175 = vst [vmem:[%s3435_s15 + $0x78] sm:$0xff] %v2174_v38  ;;  %v2180_v41 = vld [vmem:[%s3439_s16 + $0x90] sm:$0xff] }
 0x463   : >> { %2177 = vst [vmem:[%s3435_s15 + $0x80] sm:$0xff] %v2176_v39  ;;  %2179 = vst [vmem:[%s3435_s15 + $0x88] sm:$0xff] %v2178_v40  ;;  %v2182_v42 = vld [vmem:[%s3439_s16 + $0x98] sm:$0xff]  ;;  %v2184_v43 = vld [vmem:[%s3439_s16 + $0xa0] sm:$0xff] }
 0x464   : >> { %2181 = vst [vmem:[%s3435_s15 + $0x90] sm:$0xff] %v2180_v41  ;;  %2183 = vst [vmem:[%s3435_s15 + $0x98] sm:$0xff] %v2182_v42  ;;  %v2186_v44 = vld [vmem:[%s3439_s16 + $0xa8] sm:$0xff]  ;;  %v2188_v45 = vld [vmem:[%s3439_s16 + $0xb0] sm:$0xff] }
 0x465   : >> { %2185 = vst [vmem:[%s3435_s15 + $0xa0] sm:$0xff] %v2184_v43  ;;  %v2190_v46 = vld [vmem:[%s3439_s16 + $0xb8] sm:$0xff]  ;;  %2187 = vst [vmem:[%s3435_s15 + $0xa8] sm:$0xff] %v2186_v44  ;;  %v2192_v47 = vld [vmem:[%s3439_s16 + $0xc0] sm:$0xff] }
 0x466   : >> { %2189 = vst [vmem:[%s3435_s15 + $0xb0] sm:$0xff] %v2188_v45  ;;  %2191 = vst [vmem:[%s3435_s15 + $0xb8] sm:$0xff] %v2190_v46  ;;  %v2194_v48 = vld [vmem:[%s3439_s16 + $0xc8] sm:$0xff]  ;;  %v2196_v49 = vld [vmem:[%s3439_s16 + $0xd0] sm:$0xff] }
 0x467   : >> { %2193 = vst [vmem:[%s3435_s15 + $0xc0] sm:$0xff] %v2192_v47  ;;  %2195 = vst [vmem:[%s3435_s15 + $0xc8] sm:$0xff] %v2194_v48  ;;  %v2198_v50 = vld [vmem:[%s3439_s16 + $0xd8] sm:$0xff]  ;;  %v2200_v51 = vld [vmem:[%s3439_s16 + $0xe0] sm:$0xff] }
 0x468   : >> { %2197 = vst [vmem:[%s3435_s15 + $0xd0] sm:$0xff] %v2196_v49  ;;  %v2202_v52 = vld [vmem:[%s3439_s16 + $0xe8] sm:$0xff]  ;;  %2199 = vst [vmem:[%s3435_s15 + $0xd8] sm:$0xff] %v2198_v50  ;;  %v2204_v53 = vld [vmem:[%s3439_s16 + $0xf0] sm:$0xff] }
 0x469   : >> { %2201 = vst [vmem:[%s3435_s15 + $0xe0] sm:$0xff] %v2200_v51  ;;  %2203 = vst [vmem:[%s3435_s15 + $0xe8] sm:$0xff] %v2202_v52  ;;  %v2206_v54 = vld [vmem:[%s3439_s16 + $0xf8] sm:$0xff]  ;;  %v2208_v55 = vld [vmem:[%s3439_s16 + $0x100] sm:$0xff] }
 0x46a   : >> { %2205 = vst [vmem:[%s3435_s15 + $0xf0] sm:$0xff] %v2204_v53  ;;  %2207 = vst [vmem:[%s3435_s15 + $0xf8] sm:$0xff] %v2206_v54  ;;  %v2210_v56 = vld [vmem:[%s3439_s16 + $0x108] sm:$0xff]  ;;  %v2212_v57 = vld [vmem:[%s3439_s16 + $0x110] sm:$0xff] }
 0x46b   : >> { %2209 = vst [vmem:[%s3435_s15 + $0x100] sm:$0xff] %v2208_v55  ;;  %v2214_v58 = vld [vmem:[%s3439_s16 + $0x118] sm:$0xff]  ;;  %2211 = vst [vmem:[%s3435_s15 + $0x108] sm:$0xff] %v2210_v56  ;;  %v2216_v59 = vld [vmem:[%s3439_s16 + $0x120] sm:$0xff] }
 0x46c   : >> { %2213 = vst [vmem:[%s3435_s15 + $0x110] sm:$0xff] %v2212_v57  ;;  %2215 = vst [vmem:[%s3435_s15 + $0x118] sm:$0xff] %v2214_v58  ;;  %v2218_v60 = vld [vmem:[%s3439_s16 + $0x128] sm:$0xff]  ;;  %v2220_v61 = vld [vmem:[%s3439_s16 + $0x130] sm:$0xff] }
 0x46d   : >> { %2217 = vst [vmem:[%s3435_s15 + $0x120] sm:$0xff] %v2216_v59  ;;  %2219 = vst [vmem:[%s3435_s15 + $0x128] sm:$0xff] %v2218_v60  ;;  %v2222_v62 = vld [vmem:[%s3439_s16 + $0x138] sm:$0xff]  ;;  %v2224_v0 = vld [vmem:[%s3439_s16 + $0x140] sm:$0xff] }
 0x46e   : >> { %2221 = vst [vmem:[%s3435_s15 + $0x130] sm:$0xff] %v2220_v61  ;;  %v2226_v1 = vld [vmem:[%s3439_s16 + $0x148] sm:$0xff]  ;;  %2223 = vst [vmem:[%s3435_s15 + $0x138] sm:$0xff] %v2222_v62  ;;  %v2228_v2 = vld [vmem:[%s3439_s16 + $0x150] sm:$0xff] }
 0x46f   : >> { %2225 = vst [vmem:[%s3435_s15 + $0x140] sm:$0xff] %v2224_v0  ;;  %2227 = vst [vmem:[%s3435_s15 + $0x148] sm:$0xff] %v2226_v1  ;;  %v2230_v3 = vld [vmem:[%s3439_s16 + $0x158] sm:$0xff]  ;;  %v2232_v5 = vld [vmem:[%s3439_s16 + $0x160] sm:$0xff] }
 0x470   : >> { %2229 = vst [vmem:[%s3435_s15 + $0x150] sm:$0xff] %v2228_v2  ;;  %2231 = vst [vmem:[%s3435_s15 + $0x158] sm:$0xff] %v2230_v3  ;;  %v2234_v6 = vld [vmem:[%s3439_s16 + $0x168] sm:$0xff]  ;;  %v2236_v7 = vld [vmem:[%s3439_s16 + $0x170] sm:$0xff] }
 0x471   : >> { %2233 = vst [vmem:[%s3435_s15 + $0x160] sm:$0xff] %v2232_v5  ;;  %v2238_v9 = vld [vmem:[%s3439_s16 + $0x178] sm:$0xff]  ;;  %2235 = vst [vmem:[%s3435_s15 + $0x168] sm:$0xff] %v2234_v6  ;;  %v2240_v11 = vld [vmem:[%s3439_s16 + $0x180] sm:$0xff] }
 0x472   : >> { %2237 = vst [vmem:[%s3435_s15 + $0x170] sm:$0xff] %v2236_v7  ;;  %2239 = vst [vmem:[%s3435_s15 + $0x178] sm:$0xff] %v2238_v9  ;;  %v2242_v12 = vld [vmem:[%s3439_s16 + $0x188] sm:$0xff]  ;;  %v2244_v13 = vld [vmem:[%s3439_s16 + $0x190] sm:$0xff] }
 0x473   : >> { %2241 = vst [vmem:[%s3435_s15 + $0x180] sm:$0xff] %v2240_v11  ;;  %2243 = vst [vmem:[%s3435_s15 + $0x188] sm:$0xff] %v2242_v12  ;;  %v2246_v14 = vld [vmem:[%s3439_s16 + $0x198] sm:$0xff]  ;;  %v2248_v15 = vld [vmem:[%s3439_s16 + $0x1a0] sm:$0xff] }
 0x474   : >> { %2245 = vst [vmem:[%s3435_s15 + $0x190] sm:$0xff] %v2244_v13  ;;  %v2250_v16 = vld [vmem:[%s3439_s16 + $0x1a8] sm:$0xff]  ;;  %2247 = vst [vmem:[%s3435_s15 + $0x198] sm:$0xff] %v2246_v14  ;;  %v2252_v17 = vld [vmem:[%s3439_s16 + $0x1b0] sm:$0xff]  ;;  %2140 = sbr.rel (!%p2137_p8) target bundleno = 1114 (0x45a), region = 291 }
 0x475   : >> { %2249 = vst [vmem:[%s3435_s15 + $0x1a0] sm:$0xff] %v2248_v15  ;;  %2251 = vst [vmem:[%s3435_s15 + $0x1a8] sm:$0xff] %v2250_v16  ;;  %v2254_v18 = vld [vmem:[%s3439_s16 + $0x1b8] sm:$0xff]  ;;  %v2256_v19 = vld [vmem:[%s3439_s16 + $0x1c0] sm:$0xff] }
 0x476   : >> { %2253 = vst [vmem:[%s3435_s15 + $0x1b0] sm:$0xff] %v2252_v17  ;;  %2255 = vst [vmem:[%s3435_s15 + $0x1b8] sm:$0xff] %v2254_v18  ;;  %v2258_v20 = vld [vmem:[%s3439_s16 + $0x1c8] sm:$0xff]  ;;  %v2260_v21 = vld [vmem:[%s3439_s16 + $0x1d0] sm:$0xff] }
 0x477   : >> { %2257 = vst [vmem:[%s3435_s15 + $0x1c0] sm:$0xff] %v2256_v19  ;;  %v2262_v22 = vld [vmem:[%s3439_s16 + $0x1d8] sm:$0xff]  ;;  %2259 = vst [vmem:[%s3435_s15 + $0x1c8] sm:$0xff] %v2258_v20  ;;  %v2264_v23 = vld [vmem:[%s3439_s16 + $0x1e0] sm:$0xff] }
 0x478   : >> { %2261 = vst [vmem:[%s3435_s15 + $0x1d0] sm:$0xff] %v2260_v21  ;;  %2263 = vst [vmem:[%s3435_s15 + $0x1d8] sm:$0xff] %v2262_v22  ;;  %v2266_v24 = vld [vmem:[%s3439_s16 + $0x1e8] sm:$0xff]  ;;  %v2268_v25 = vld [vmem:[%s3439_s16 + $0x1f0] sm:$0xff] }
 0x479   : >> { %2265 = vst [vmem:[%s3435_s15 + $0x1e0] sm:$0xff] %v2264_v23  ;;  %2267 = vst [vmem:[%s3435_s15 + $0x1e8] sm:$0xff] %v2266_v24  ;;  %v2270_v26 = vld [vmem:[%s3439_s16 + $0x1f8] sm:$0xff]  ;;  %s4708_s16 = smov %s4348_s9 }
 0x47a   : >> { %2269 = vst [vmem:[%s3435_s15 + $0x1f0] sm:$0xff] %v2268_v25  ;;  %2271 = vst [vmem:[%s3435_s15 + $0x1f8] sm:$0xff] %v2270_v26  ;;  %s4707_s15 = smov %s4351_s30 }
 0x47b PF: > { %s4457_s18 = sand.u32 63, %s2131_s23   ;;  %s2858_s11 = sshll.u32 %s4281_s13, 13 }
 0x47c   : > { %s2283_s27 = sshra.s32 %s2858_s11, 4  ;;  %p2838_p9 = scmp.le.s32.totalorder %s4457_s18, 0 }
 0x47d   : > { %s2284_s7 = scalar_lea.vmem %s4257_s24, %s2283_s27 [#allocation3]   ;;  %s2287_s21 = scalar_lea.vmem %s4267_s0, %s2283_s27  }
 0x47e   : > { %2668 = sbr.rel (%p2838_p9) target bundleno = 1167 (0x48f), region = 296  ;;  %s3449_s8 = smov (!%p2838_p9), %s2287_s21  }
 0x47f   : > { %s3453_s10 = smov (!%p2838_p9), %s2284_s7   ;;  %s3457_s12 = smov (!%p2838_p9), 0  }
 0x480   : > { %s3461_s26 = smov (!%p2838_p9), 0  }
 0x485 LB: >> { %v2299_v63 = vld [vmem:[%s3455_s10] sm:$0xff]  ;;  %s2301_s23 = sadd.s32 1, %s3459_s12  ;;  %s2293_s26 = sadd.s32 1, %s3463_s26   ;;  %s3463_s26 = sphi %s3461_s26, %s2293_s26   ;;  %s3459_s12 = sphi %s3457_s12, %s3458_s12   ;;  %s3455_s10 = sphi %s3453_s10, %s2306_s10   ;;  %s3451_s8 = sphi %s3449_s8, %s2307_s8  }
 0x486   : >> { %2300 = vst [vmem:[%s3451_s8] sm:$0xff] %v2299_v63  ;;  %p2302_p10 = scmp.ge.s32.totalorder %s2301_s23, %s4457_s18  ;;  %p2292_p11 = scmp.ge.s32.totalorder %s2293_s26, %s4457_s18 }
 0x488   : >> { %s4733_s23 = smov (%p2302_p10, %s2301_s23), 0  ;;  %2295 = sbr.rel (!%p2292_p11) target bundleno = 1157 (0x485), region = 302 }
 0x489   : >> { %s2839_s13 = sshll.u32 %s4733_s23, 3  ;;  %s3458_s12 = smov %s4733_s23  }
 0x48a   : >> { %s2306_s10 = scalar_lea.vmem %s2284_s7, %s2839_s13 [#allocation3]   ;;  %s2307_s8 = scalar_lea.vmem %s2287_s21, %s2839_s13  }
 0x48f PF: > { %2310 = sbr.rel (%p2127_p5) target bundleno = 1238 (0x4d6), region = 155  ;;  %s4469_s15 = ssub.s32 (!%p2127_p5), %s4729_s17, %s4274_s29 }
 0x490   : > { %s2316_s16 = sshrl.u32 (!%p2127_p5), %s4729_s17, 3  ;;  %s2313_s14 = scalar_lea.vmem (!%p2127_p5), %s4257_s24, %s4469_s15 [#allocation3] }
 0x491   : > { %s2315_s20 = scalar_lea.vmem (!%p2127_p5), %s4267_s0, %s4469_s15  ;;  %s4478_s19 = sshrl.u32 (!%p2127_p5), %s2316_s16, 6 }
 0x492   : > { %p2841_p12 = scmp.le.s32.totalorder (!%p2127_p5), %s4478_s19, 0 }
 0x496   : > { %2682 = sbr.rel (%p2841_p12) target bundleno = 1214 (0x4be), region = 307  ;;  %s4710_s9 = smov (!%p2841_p12), %s4267_s0 }
 0x497   : > { %s4711_s30 = smov (!%p2841_p12), %s4257_s24  ;;  %s4487_s18 = smov (!%p2841_p12), 0  }
 0x498   : > { %s4489_s11 = smov (!%p2841_p12), 0  }
 0x49d LB: >> { %v2329_v4 = vld [vmem:[%s3471_s30] sm:$0xff]  ;;  %v2331_v8 = vld [vmem:[%s3471_s30 + $0x8] sm:$0xff]  ;;  %v2333_v27 = vld [vmem:[%s3471_s30 + $0x10] sm:$0xff]  ;;  %s2457_s27 = sadd.s32 1, %s3475_s18  ;;  %s2323_s11 = sadd.s32 1, %s3479_s11   ;;  %s3479_s11 = sphi %s4489_s11, %s2323_s11   ;;  %s3475_s18 = sphi %s4487_s18, %s4714_s18   ;;  %s3471_s30 = sphi %s4711_s30, %s4713_s30   ;;  %s3467_s9 = sphi %s4710_s9, %s4712_s9  }
 0x49e   : >> { %2330 = vst [vmem:[%s3467_s9] sm:$0xff] %v2329_v4  ;;  %2332 = vst [vmem:[%s3467_s9 + $0x8] sm:$0xff] %v2331_v8  ;;  %v2335_v10 = vld [vmem:[%s3471_s30 + $0x18] sm:$0xff]  ;;  %v2337_v28 = vld [vmem:[%s3471_s30 + $0x20] sm:$0xff]  ;;  %p2458_p13 = scmp.ge.s32.totalorder %s2457_s27, %s4478_s19  ;;  %p2322_p0 = scmp.ge.s32.totalorder %s2323_s11, %s4478_s19 }
 0x49f   : >> { %2334 = vst [vmem:[%s3467_s9 + $0x10] sm:$0xff] %v2333_v27  ;;  %v2339_v29 = vld [vmem:[%s3471_s30 + $0x28] sm:$0xff]  ;;  %2336 = vst [vmem:[%s3467_s9 + $0x18] sm:$0xff] %v2335_v10  ;;  %v2341_v30 = vld [vmem:[%s3471_s30 + $0x30] sm:$0xff] }
 0x4a0   : >> { %2338 = vst [vmem:[%s3467_s9 + $0x20] sm:$0xff] %v2337_v28  ;;  %2340 = vst [vmem:[%s3467_s9 + $0x28] sm:$0xff] %v2339_v29  ;;  %v2343_v31 = vld [vmem:[%s3471_s30 + $0x38] sm:$0xff]  ;;  %v2345_v32 = vld [vmem:[%s3471_s30 + $0x40] sm:$0xff]  ;;  %s4735_s27 = smov (%p2458_p13, %s2457_s27), 0 }
 0x4a1   : >> { %2342 = vst [vmem:[%s3467_s9 + $0x30] sm:$0xff] %v2341_v30  ;;  %2344 = vst [vmem:[%s3467_s9 + $0x38] sm:$0xff] %v2343_v31  ;;  %v2347_v33 = vld [vmem:[%s3471_s30 + $0x48] sm:$0xff]  ;;  %v2349_v34 = vld [vmem:[%s3471_s30 + $0x50] sm:$0xff]  ;;  %s2842_s7 = sshll.u32 %s4735_s27, 9  ;;  %s4714_s18 = smov %s4735_s27 }
 0x4a2   : >> { %2346 = vst [vmem:[%s3467_s9 + $0x40] sm:$0xff] %v2345_v32  ;;  %v2351_v35 = vld [vmem:[%s3471_s30 + $0x58] sm:$0xff]  ;;  %2348 = vst [vmem:[%s3467_s9 + $0x48] sm:$0xff] %v2347_v33  ;;  %v2353_v36 = vld [vmem:[%s3471_s30 + $0x60] sm:$0xff]  ;;  %s4545_s21 = scalar_lea.vmem %s4257_s24, %s2842_s7 [#allocation3]   ;;  %s4548_s8 = scalar_lea.vmem %s4267_s0, %s2842_s7  }
 0x4a3   : >> { %2350 = vst [vmem:[%s3467_s9 + $0x50] sm:$0xff] %v2349_v34  ;;  %2352 = vst [vmem:[%s3467_s9 + $0x58] sm:$0xff] %v2351_v35  ;;  %v2355_v37 = vld [vmem:[%s3471_s30 + $0x68] sm:$0xff]  ;;  %v2357_v38 = vld [vmem:[%s3471_s30 + $0x70] sm:$0xff] }
 0x4a4   : >> { %2354 = vst [vmem:[%s3467_s9 + $0x60] sm:$0xff] %v2353_v36  ;;  %2356 = vst [vmem:[%s3467_s9 + $0x68] sm:$0xff] %v2355_v37  ;;  %v2359_v39 = vld [vmem:[%s3471_s30 + $0x78] sm:$0xff]  ;;  %v2361_v40 = vld [vmem:[%s3471_s30 + $0x80] sm:$0xff] }
 0x4a5   : >> { %2358 = vst [vmem:[%s3467_s9 + $0x70] sm:$0xff] %v2357_v38  ;;  %v2363_v41 = vld [vmem:[%s3471_s30 + $0x88] sm:$0xff]  ;;  %2360 = vst [vmem:[%s3467_s9 + $0x78] sm:$0xff] %v2359_v39  ;;  %v2365_v42 = vld [vmem:[%s3471_s30 + $0x90] sm:$0xff] }
 0x4a6   : >> { %2362 = vst [vmem:[%s3467_s9 + $0x80] sm:$0xff] %v2361_v40  ;;  %2364 = vst [vmem:[%s3467_s9 + $0x88] sm:$0xff] %v2363_v41  ;;  %v2367_v43 = vld [vmem:[%s3471_s30 + $0x98] sm:$0xff]  ;;  %v2369_v44 = vld [vmem:[%s3471_s30 + $0xa0] sm:$0xff] }
 0x4a7   : >> { %2366 = vst [vmem:[%s3467_s9 + $0x90] sm:$0xff] %v2365_v42  ;;  %2368 = vst [vmem:[%s3467_s9 + $0x98] sm:$0xff] %v2367_v43  ;;  %v2371_v45 = vld [vmem:[%s3471_s30 + $0xa8] sm:$0xff]  ;;  %v2373_v46 = vld [vmem:[%s3471_s30 + $0xb0] sm:$0xff] }
 0x4a8   : >> { %2370 = vst [vmem:[%s3467_s9 + $0xa0] sm:$0xff] %v2369_v44  ;;  %v2375_v47 = vld [vmem:[%s3471_s30 + $0xb8] sm:$0xff]  ;;  %2372 = vst [vmem:[%s3467_s9 + $0xa8] sm:$0xff] %v2371_v45  ;;  %v2377_v48 = vld [vmem:[%s3471_s30 + $0xc0] sm:$0xff] }
 0x4a9   : >> { %2374 = vst [vmem:[%s3467_s9 + $0xb0] sm:$0xff] %v2373_v46  ;;  %2376 = vst [vmem:[%s3467_s9 + $0xb8] sm:$0xff] %v2375_v47  ;;  %v2379_v49 = vld [vmem:[%s3471_s30 + $0xc8] sm:$0xff]  ;;  %v2381_v50 = vld [vmem:[%s3471_s30 + $0xd0] sm:$0xff] }
 0x4aa   : >> { %2378 = vst [vmem:[%s3467_s9 + $0xc0] sm:$0xff] %v2377_v48  ;;  %2380 = vst [vmem:[%s3467_s9 + $0xc8] sm:$0xff] %v2379_v49  ;;  %v2383_v51 = vld [vmem:[%s3471_s30 + $0xd8] sm:$0xff]  ;;  %v2385_v52 = vld [vmem:[%s3471_s30 + $0xe0] sm:$0xff] }
 0x4ab   : >> { %2382 = vst [vmem:[%s3467_s9 + $0xd0] sm:$0xff] %v2381_v50  ;;  %v2387_v53 = vld [vmem:[%s3471_s30 + $0xe8] sm:$0xff]  ;;  %2384 = vst [vmem:[%s3467_s9 + $0xd8] sm:$0xff] %v2383_v51  ;;  %v2389_v54 = vld [vmem:[%s3471_s30 + $0xf0] sm:$0xff] }
 0x4ac   : >> { %2386 = vst [vmem:[%s3467_s9 + $0xe0] sm:$0xff] %v2385_v52  ;;  %2388 = vst [vmem:[%s3467_s9 + $0xe8] sm:$0xff] %v2387_v53  ;;  %v2391_v55 = vld [vmem:[%s3471_s30 + $0xf8] sm:$0xff]  ;;  %v2393_v56 = vld [vmem:[%s3471_s30 + $0x100] sm:$0xff] }
 0x4ad   : >> { %2390 = vst [vmem:[%s3467_s9 + $0xf0] sm:$0xff] %v2389_v54  ;;  %2392 = vst [vmem:[%s3467_s9 + $0xf8] sm:$0xff] %v2391_v55  ;;  %v2395_v57 = vld [vmem:[%s3471_s30 + $0x108] sm:$0xff]  ;;  %v2397_v58 = vld [vmem:[%s3471_s30 + $0x110] sm:$0xff] }
 0x4ae   : >> { %2394 = vst [vmem:[%s3467_s9 + $0x100] sm:$0xff] %v2393_v56  ;;  %v2399_v59 = vld [vmem:[%s3471_s30 + $0x118] sm:$0xff]  ;;  %2396 = vst [vmem:[%s3467_s9 + $0x108] sm:$0xff] %v2395_v57  ;;  %v2401_v60 = vld [vmem:[%s3471_s30 + $0x120] sm:$0xff] }
 0x4af   : >> { %2398 = vst [vmem:[%s3467_s9 + $0x110] sm:$0xff] %v2397_v58  ;;  %2400 = vst [vmem:[%s3467_s9 + $0x118] sm:$0xff] %v2399_v59  ;;  %v2403_v61 = vld [vmem:[%s3471_s30 + $0x128] sm:$0xff]  ;;  %v2405_v62 = vld [vmem:[%s3471_s30 + $0x130] sm:$0xff] }
 0x4b0   : >> { %2402 = vst [vmem:[%s3467_s9 + $0x120] sm:$0xff] %v2401_v60  ;;  %2404 = vst [vmem:[%s3467_s9 + $0x128] sm:$0xff] %v2403_v61  ;;  %v2407_v0 = vld [vmem:[%s3471_s30 + $0x138] sm:$0xff]  ;;  %v2409_v1 = vld [vmem:[%s3471_s30 + $0x140] sm:$0xff] }
 0x4b1   : >> { %2406 = vst [vmem:[%s3467_s9 + $0x130] sm:$0xff] %v2405_v62  ;;  %v2411_v2 = vld [vmem:[%s3471_s30 + $0x148] sm:$0xff]  ;;  %2408 = vst [vmem:[%s3467_s9 + $0x138] sm:$0xff] %v2407_v0  ;;  %v2413_v3 = vld [vmem:[%s3471_s30 + $0x150] sm:$0xff] }
 0x4b2   : >> { %2410 = vst [vmem:[%s3467_s9 + $0x140] sm:$0xff] %v2409_v1  ;;  %2412 = vst [vmem:[%s3467_s9 + $0x148] sm:$0xff] %v2411_v2  ;;  %v2415_v5 = vld [vmem:[%s3471_s30 + $0x158] sm:$0xff]  ;;  %v2417_v6 = vld [vmem:[%s3471_s30 + $0x160] sm:$0xff] }
 0x4b3   : >> { %2414 = vst [vmem:[%s3467_s9 + $0x150] sm:$0xff] %v2413_v3  ;;  %2416 = vst [vmem:[%s3467_s9 + $0x158] sm:$0xff] %v2415_v5  ;;  %v2419_v7 = vld [vmem:[%s3471_s30 + $0x168] sm:$0xff]  ;;  %v2421_v9 = vld [vmem:[%s3471_s30 + $0x170] sm:$0xff] }
 0x4b4   : >> { %2418 = vst [vmem:[%s3467_s9 + $0x160] sm:$0xff] %v2417_v6  ;;  %v2423_v11 = vld [vmem:[%s3471_s30 + $0x178] sm:$0xff]  ;;  %2420 = vst [vmem:[%s3467_s9 + $0x168] sm:$0xff] %v2419_v7  ;;  %v2425_v12 = vld [vmem:[%s3471_s30 + $0x180] sm:$0xff] }
 0x4b5   : >> { %2422 = vst [vmem:[%s3467_s9 + $0x170] sm:$0xff] %v2421_v9  ;;  %2424 = vst [vmem:[%s3467_s9 + $0x178] sm:$0xff] %v2423_v11  ;;  %v2427_v13 = vld [vmem:[%s3471_s30 + $0x188] sm:$0xff]  ;;  %v2429_v14 = vld [vmem:[%s3471_s30 + $0x190] sm:$0xff] }
 0x4b6   : >> { %2426 = vst [vmem:[%s3467_s9 + $0x180] sm:$0xff] %v2425_v12  ;;  %2428 = vst [vmem:[%s3467_s9 + $0x188] sm:$0xff] %v2427_v13  ;;  %v2431_v15 = vld [vmem:[%s3471_s30 + $0x198] sm:$0xff]  ;;  %v2433_v16 = vld [vmem:[%s3471_s30 + $0x1a0] sm:$0xff] }
 0x4b7   : >> { %2430 = vst [vmem:[%s3467_s9 + $0x190] sm:$0xff] %v2429_v14  ;;  %v2435_v17 = vld [vmem:[%s3471_s30 + $0x1a8] sm:$0xff]  ;;  %2432 = vst [vmem:[%s3467_s9 + $0x198] sm:$0xff] %v2431_v15  ;;  %v2437_v18 = vld [vmem:[%s3471_s30 + $0x1b0] sm:$0xff]  ;;  %2325 = sbr.rel (!%p2322_p0) target bundleno = 1181 (0x49d), region = 313 }
 0x4b8   : >> { %2434 = vst [vmem:[%s3467_s9 + $0x1a0] sm:$0xff] %v2433_v16  ;;  %2436 = vst [vmem:[%s3467_s9 + $0x1a8] sm:$0xff] %v2435_v17  ;;  %v2439_v19 = vld [vmem:[%s3471_s30 + $0x1b8] sm:$0xff]  ;;  %v2441_v20 = vld [vmem:[%s3471_s30 + $0x1c0] sm:$0xff] }
 0x4b9   : >> { %2438 = vst [vmem:[%s3467_s9 + $0x1b0] sm:$0xff] %v2437_v18  ;;  %2440 = vst [vmem:[%s3467_s9 + $0x1b8] sm:$0xff] %v2439_v19  ;;  %v2443_v21 = vld [vmem:[%s3471_s30 + $0x1c8] sm:$0xff]  ;;  %v2445_v22 = vld [vmem:[%s3471_s30 + $0x1d0] sm:$0xff] }
 0x4ba   : >> { %2442 = vst [vmem:[%s3467_s9 + $0x1c0] sm:$0xff] %v2441_v20  ;;  %v2447_v23 = vld [vmem:[%s3471_s30 + $0x1d8] sm:$0xff]  ;;  %2444 = vst [vmem:[%s3467_s9 + $0x1c8] sm:$0xff] %v2443_v21  ;;  %v2449_v24 = vld [vmem:[%s3471_s30 + $0x1e0] sm:$0xff] }
 0x4bb   : >> { %2446 = vst [vmem:[%s3467_s9 + $0x1d0] sm:$0xff] %v2445_v22  ;;  %2448 = vst [vmem:[%s3467_s9 + $0x1d8] sm:$0xff] %v2447_v23  ;;  %v2451_v25 = vld [vmem:[%s3471_s30 + $0x1e8] sm:$0xff]  ;;  %v2453_v26 = vld [vmem:[%s3471_s30 + $0x1f0] sm:$0xff] }
 0x4bc   : >> { %2450 = vst [vmem:[%s3467_s9 + $0x1e0] sm:$0xff] %v2449_v24  ;;  %2452 = vst [vmem:[%s3467_s9 + $0x1e8] sm:$0xff] %v2451_v25  ;;  %v2455_v63 = vld [vmem:[%s3471_s30 + $0x1f8] sm:$0xff]  ;;  %s4713_s30 = smov %s4545_s21 }
 0x4bd   : >> { %2454 = vst [vmem:[%s3467_s9 + $0x1f0] sm:$0xff] %v2453_v26  ;;  %2456 = vst [vmem:[%s3467_s9 + $0x1f8] sm:$0xff] %v2455_v63  ;;  %s4712_s9 = smov %s4548_s8 }
 0x4be PF: > { %s4654_s10 = sand.u32 63, %s2316_s16   ;;  %s2860_s12 = sshll.u32 %s4478_s19, 13 }
 0x4bf   : > { %s2468_s26 = sshra.s32 %s2860_s12, 4  ;;  %p2847_p1 = scmp.le.s32.totalorder %s4654_s10, 0 }
 0x4c0   : > { %s2469_s23 = scalar_lea.vmem %s4257_s24, %s2468_s26 [#allocation3]   ;;  %s2472_s13 = scalar_lea.vmem %s4267_s0, %s2468_s26  }
 0x4c1   : > { %2696 = sbr.rel (%p2847_p1) target bundleno = 1234 (0x4d2), region = 318  ;;  %s3481_s7 = smov (!%p2847_p1), %s2472_s13  }
 0x4c2   : > { %s3485_s27 = smov (!%p2847_p1), %s2469_s23   ;;  %s3489_s21 = smov (!%p2847_p1), 0  }
 0x4c3   : > { %s3493_s11 = smov (!%p2847_p1), 0  }
 0x4c8 LB: >> { %v2484_v4 = vld [vmem:[%s3487_s27] sm:$0xff]  ;;  %s2486_s16 = sadd.s32 1, %s3491_s21  ;;  %s2478_s11 = sadd.s32 1, %s3495_s11   ;;  %s3495_s11 = sphi %s3493_s11, %s2478_s11   ;;  %s3491_s21 = sphi %s3489_s21, %s3490_s21   ;;  %s3487_s27 = sphi %s3485_s27, %s2491_s27   ;;  %s3483_s7 = sphi %s3481_s7, %s2492_s7  }
 0x4c9   : >> { %2485 = vst [vmem:[%s3483_s7] sm:$0xff] %v2484_v4  ;;  %p2487_p2 = scmp.ge.s32.totalorder %s2486_s16, %s4654_s10  ;;  %p2477_p3 = scmp.ge.s32.totalorder %s2478_s11, %s4654_s10 }
 0x4cb   : >> { %s4737_s16 = smov (%p2487_p2, %s2486_s16), 0  ;;  %2480 = sbr.rel (!%p2477_p3) target bundleno = 1224 (0x4c8), region = 324 }
 0x4cc   : >> { %s2848_s19 = sshll.u32 %s4737_s16, 3  ;;  %s3490_s21 = smov %s4737_s16  }
 0x4cd   : >> { %s2491_s27 = scalar_lea.vmem %s2469_s23, %s2848_s19 [#allocation3]   ;;  %s2492_s7 = scalar_lea.vmem %s2472_s13, %s2848_s19  }
 0x4d2 PF: > { %s3501_s9 = smov 0  }
 0x4d3   : > { %s2493_s30 = sshllo.u32 %s3501_s9, %s4274_s29 }
 0x4d4   : > { %v2502_v8 = vld [vmem:[%s2313_s14] sm:%s2493_s30] }
 0x4d5   : > { %2503 = vst [vmem:[%s2315_s20] sm:%s2493_s30] %v2502_v8 }
 0x4d6 PF: > { %p2850_p5 = scmp.ge.u32.totalorder %s4729_s17, 8 }
 0x4d7   : > { %s3502_s18 = smov (!%p2850_p5), 0  }
 0x4d8   : > { %2114 = sbr.rel (%p2850_p5) target bundleno = 1247 (0x4df), region = 126  ;;  %s2115_s8 = sshllo.u32 (!%p2850_p5), %s3502_s18, %s4729_s17 }
 0x4d9   : > { %v2124_v27 = vld [vmem:[%s4257_s24] sm:%s2115_s8] (!%p2850_p5) }
 0x4da   : > { %2125 = vst [vmem:[%s4267_s0] sm:%s2115_s8] (!%p2850_p5), %v2124_v27 }
 0x4df PF: > { %p13_p4 = scmp.ge.s32.totalorder %s3555_s25, 4   ;;  %s4715_s21 = smov %s3363_s22 }
 0x4e0   : > { %s4716_s22 = smov %s3566_s28  ;;  %s4717_s23 = smov %s3555_s25 }
 0x4e1   :  { %15 = sbr.rel (!%p13_p4) target bundleno = 4 (0x4), region = 335 }

</bundles_post_ra>
